<compile_context>
chip_gen: v7x
topology: tpu7x:2x2x1
jax: 0.10.0
libtpu: 0.0.40
codegen_flags: <defaults>
</compile_context>

<pallas_src>
import random

import jax
import jax.numpy as jnp
from jax.experimental import pallas as pl
from jax.experimental.pallas import tpu as pltpu


def _get_positive_k(alpha, n):
    # Mirrors WildcatPool2dFunction.get_positive_k exactly.
    if alpha <= 0:
        return 0
    elif alpha < 1:
        return round(alpha * n)
    elif alpha > n:
        return int(n)
    else:
        return int(alpha)


def _round_up(v, m):
    return ((v + m - 1) // m) * m


def _default_compute_dtype(x_dtype):
    if jnp.dtype(x_dtype) != jnp.dtype(jnp.bfloat16):
        return jnp.float32
    try:
        kind = jax.devices()[0].device_kind.lower()
    except Exception:
        kind = ""
    # v5e and older have no native bf16 VPU -> use an f32 working copy there.
    if ("v6" in kind) or ("v7" in kind):
        return jnp.bfloat16
    return jnp.float32


def _make_static_kernel(k, compute_dtype):
    """Kernel with a compile-time k; the top-k loop is fully unrolled."""
    k_f32 = float(k)

    def kernel(x_ref, o_ref):
        # x_ref: (n, TC) -- spatial on sublanes, (b, c) rows on lanes.
        x0 = x_ref[...].astype(compute_dtype)
        neg_inf = jnp.array(-jnp.inf, dtype=compute_dtype)

        # Peeled iteration 0: stats straight from the input block.
        m = jnp.max(x0, axis=0, keepdims=True)                    # (1, TC)
        is_max = x0 == m                                          # (n, TC)
        cnt = jnp.sum(jnp.where(is_max, 1.0, 0.0), axis=0, keepdims=True)
        take = jnp.minimum(cnt, k_f32)
        acc = take * m.astype(jnp.float32)
        rem = k_f32 - take

        if k > 1:
            work = jnp.where(is_max, neg_inf, x0)

            def body(_, carry):
                work, acc, rem = carry
                m = jnp.max(work, axis=0, keepdims=True)
                is_max = work == m
                cnt = jnp.sum(jnp.where(is_max, 1.0, 0.0), axis=0,
                              keepdims=True)
                take = jnp.minimum(cnt, rem)
                # take == 0 guards 0 * (-inf) once a row is fully consumed.
                acc = acc + jnp.where(take > 0.0,
                                      take * m.astype(jnp.float32), 0.0)
                rem = rem - take
                work = jnp.where(is_max, neg_inf, work)
                return work, acc, rem

            _, acc, rem = jax.lax.fori_loop(1, k, body, (work, acc, rem),
                                            unroll=True)

        o_ref[...] = (acc / k_f32).astype(o_ref.dtype)

    return kernel


def _make_dynamic_kernel(compute_dtype):
    """Kernel with k as an SMEM scalar (one compile serves every drawn k)."""

    def kernel(k_ref, x_ref, o_ref, work_ref):
        k = k_ref[0]
        k_f32 = k.astype(jnp.float32)

        x0 = x_ref[...].astype(compute_dtype)
        neg_inf = jnp.array(-jnp.inf, dtype=compute_dtype)

        # Peeled iteration 0.
        m = jnp.max(x0, axis=0, keepdims=True)
        is_max = x0 == m
        cnt = jnp.sum(jnp.where(is_max, 1.0, 0.0), axis=0, keepdims=True)
        take = jnp.minimum(cnt, k_f32)
        acc0 = take * m.astype(jnp.float32)
        rem0 = k_f32 - take

        # Only materialize the masked working copy if more iterations follow.
        @pl.when(k > 1)
        def _():
            work_ref[...] = jnp.where(is_max, neg_inf, x0)

        def body(_, carry):
            acc, rem = carry
            w = work_ref[...]
            m = jnp.max(w, axis=0, keepdims=True)
            is_max = w == m
            cnt = jnp.sum(jnp.where(is_max, 1.0, 0.0), axis=0, keepdims=True)
            take = jnp.minimum(cnt, rem)
            acc = acc + jnp.where(take > 0.0,
                                  take * m.astype(jnp.float32), 0.0)
            rem = rem - take
            work_ref[...] = jnp.where(is_max, neg_inf, w)
            return acc, rem

        # Each iteration removes >= 1 element per still-active row, so k
        # iterations (1 peeled + k-1 here) always suffice; rows with duplicated
        # maxima finish early and become no-ops via the `take` counter.
        acc, _ = jax.lax.fori_loop(1, k, body, (acc0, rem0))

        o_ref[...] = (acc / k_f32).astype(o_ref.dtype)

    return kernel


def wildcat_pool2d(x, alpha=0.01, *, seed=0, k=None, col_tile=2048,
                   compute_dtype=None, static_k_threshold=8,
                   max_block_cols=None):
    """Pallas implementation of WildcatPool2d.forward.

    x: (B, C, H, W) array.  Returns ((B, C) output, k).
    """
    b, c, h, w = x.shape
    n = h * w

    if k is None:
        kmax = _get_positive_k(alpha, n)
        # Deterministic stand-in for the module's host-side random.randint.
        k = random.Random(seed).randint(1, kmax + 1)
    # randint's upper bound is inclusive, so k can reach n + 1 when kmax == n;
    # clamp so we never select more elements than exist.
    k = max(1, min(int(k), n))

    rows = b * c

    if compute_dtype is None:
        compute_dtype = _default_compute_dtype(x.dtype)
    # Never let a narrower working dtype silently change values/tie structure.
    compute_dtype = jnp.promote_types(compute_dtype, x.dtype)

    # Transposed layout: (n, rows) with the (b, c) rows on the 128-lane axis.
    x_t = jnp.transpose(x, (2, 3, 0, 1)).reshape(n, rows)

    in_bytes = jnp.dtype(x.dtype).itemsize
    work_bytes = jnp.dtype(compute_dtype).itemsize
    # Double-buffered input block + working copy + f32 mask/count temporaries.
    per_col_bytes = n * (2 * in_bytes + 2 * work_bytes) + 64
    vmem_budget = 12 * 1024 * 1024   # fits default scoped limits on v5e/v6e/v7x
    budget_cols = max(128, vmem_budget // per_col_bytes)
    if max_block_cols is not None:
        budget_cols = min(budget_cols, int(max_block_cols))

    if rows <= budget_cols:
        # Single block: block dims equal the full array dims, so there is no
        # padding and no lane-divisibility constraint at all.
        tc = rows
        cols_padded = rows
    else:
        tc = max(128, (min(int(col_tile), int(budget_cols)) // 128) * 128)
        cols_padded = _round_up(rows, tc)
        if cols_padded != rows:
            # Padded lanes compute independent garbage and are sliced off; the
            # pad rides along with the transpose copy above.
            x_t = jnp.pad(x_t, ((0, 0), (0, cols_padded - rows)))
    grid = (cols_padded // tc,)

    out_shape = jax.ShapeDtypeStruct((1, cols_padded), x.dtype)
    compiler_params = pltpu.CompilerParams(dimension_semantics=("parallel",))

    if k <= static_k_threshold:
        # Static-k fast path: loop fully unrolled, no scratch, no SMEM scalar.
        kernel = _make_static_kernel(k, compute_dtype)
        grid_spec = pltpu.PrefetchScalarGridSpec(
            num_scalar_prefetch=0,
            grid=grid,
            in_specs=[pl.BlockSpec((n, tc), lambda i: (0, i))],
            out_specs=pl.BlockSpec((1, tc), lambda i: (0, i)),
        )
        out = pl.pallas_call(
            kernel,
            out_shape=out_shape,
            grid_spec=grid_spec,
            compiler_params=compiler_params,
        )(x_t)
    else:
        # Dynamic-k path: k lives in SMEM; one compiled kernel for any k.
        kernel = _make_dynamic_kernel(compute_dtype)
        grid_spec = pltpu.PrefetchScalarGridSpec(
            num_scalar_prefetch=1,
            grid=grid,
            in_specs=[pl.BlockSpec((n, tc), lambda i, k_ref: (0, i))],
            out_specs=pl.BlockSpec((1, tc), lambda i, k_ref: (0, i)),
            scratch_shapes=[pltpu.VMEM((n, tc), compute_dtype)],
        )
        out = pl.pallas_call(
            kernel,
            out_shape=out_shape,
            grid_spec=grid_spec,
            compiler_params=compiler_params,
        )(jnp.array([k], dtype=jnp.int32), x_t)

    return out[0, :rows].reshape(b, c), k


def _reference(x, k):
    # Pure-JAX reference: mean of top-k spatial values per (b, c).
    b, c, h, w = x.shape
    flat = x.reshape(b, c, h * w).astype(jnp.float32)
    topk = jax.lax.top_k(flat, k)[0]
    return jnp.mean(topk, axis=-1).astype(x.dtype)


if __name__ == "__main__":
    key = jax.random.PRNGKey(0)
    k0, k1, k2 = jax.random.split(key, 3)

    # 1) Default alpha (k is 1..4) -> static unrolled path, single block.
    B, C, H, W = 2, 4, 16, 16
    x = jax.random.normal(k0, (B, C, H, W), dtype=jnp.float32)
    out, kk = wildcat_pool2d(x, alpha=0.01, seed=0)
    out = jax.block_until_ready(out)
    ref = _reference(x, kk)
    assert out.shape == (B, C), out.shape
    assert jnp.allclose(out, ref, atol=1e-5, rtol=1e-5), (out, ref, kk)

    # 2) Duplicated values + explicit k > threshold -> dynamic-k path with ties.
    x_dup = jnp.round(x * 4.0) / 4.0
    out2, kk2 = wildcat_pool2d(x_dup, alpha=0.1, k=17)
    out2 = jax.block_until_ready(out2)
    ref2 = _reference(x_dup, kk2)
    assert jnp.allclose(out2, ref2, atol=1e-5, rtol=1e-5), (out2, ref2, kk2)

    # 3) Ragged row count + forced column tiling (padding + multi-tile grid).
    x3 = jax.random.normal(k1, (3, 100, 8, 8), dtype=jnp.float32)
    out3, kk3 = wildcat_pool2d(x3, alpha=0.25, seed=2, max_block_cols=128)
    out3 = jax.block_until_ready(out3)
    ref3 = _reference(x3, kk3)
    assert out3.shape == (3, 100), out3.shape
    assert jnp.allclose(out3, ref3, atol=1e-5, rtol=1e-5), (out3, ref3, kk3)

    # 4) bf16 input (bf16 working copy on v6e/v7x, f32 on v5e/older).
    x4 = jax.random.normal(k2, (2, 4, 8, 8), dtype=jnp.bfloat16)
    out4, kk4 = wildcat_pool2d(x4, alpha=0.05, seed=3)
    out4 = jax.block_until_ready(out4)
    ref4 = _reference(x4, kk4)
    assert jnp.allclose(out4.astype(jnp.float32), ref4.astype(jnp.float32),
                        atol=2e-2, rtol=2e-2), (out4, ref4, kk4)

    print("KERNEL_OK")
</pallas_src>

<mosaic_0001>
module attributes {stable_mosaic.version = 11 : i64} {
  func.func @kernel(%arg0: i32, %arg1: memref<256x8xf32, #tpu.memory_space<vmem>>, %arg2: memref<1x8xf32, #tpu.memory_space<vmem>>) attributes {dimension_semantics = [#tpu.dimension_semantics<parallel>], iteration_bounds = array<i64: 1>, scalar_prefetch = 0 : i64, scratch_operands = 0 : i64, tpu.core_type = #tpu.core_type<tc>, window_params = [{transform_indices = @transform_0, window_bounds = array<i64: 256, 8>}, {transform_indices = @transform_1, window_bounds = array<i64: 1, 8>}]} {
    %c0 = arith.constant 0 : index
    %c0_0 = arith.constant 0 : index
    %0 = vector.load %arg1[%c0, %c0_0] : memref<256x8xf32, #tpu.memory_space<vmem>>, vector<256x8xf32>
    %cst = arith.constant dense<0xFF800000> : vector<8xf32>
    %1 = vector.multi_reduction <maximumf>, %0, %cst [0] : vector<256x8xf32> to vector<8xf32>
    %2 = vector.shape_cast %1 : vector<8xf32> to vector<1x8xf32>
    %3 = vector.broadcast %2 : vector<1x8xf32> to vector<256x8xf32>
    %4 = arith.cmpf oeq, %0, %3 : vector<256x8xf32>
    %cst_1 = arith.constant 1.000000e+00 : f32
    %cst_2 = arith.constant 0.000000e+00 : f32
    %5 = vector.broadcast %cst_1 : f32 to vector<256x8xf32>
    %6 = vector.broadcast %cst_2 : f32 to vector<256x8xf32>
    %7 = arith.select %4, %5, %6 : vector<256x8xi1>, vector<256x8xf32>
    %cst_3 = arith.constant dense<0.000000e+00> : vector<8xf32>
    %8 = vector.multi_reduction <add>, %7, %cst_3 [0] : vector<256x8xf32> to vector<8xf32>
    %9 = vector.shape_cast %8 : vector<8xf32> to vector<1x8xf32>
    %cst_4 = arith.constant 4.000000e+00 : f32
    %10 = vector.broadcast %cst_4 : f32 to vector<1x8xf32>
    %11 = arith.minimumf %9, %10 : vector<1x8xf32>
    %12 = arith.mulf %11, %2 : vector<1x8xf32>
    %cst_5 = arith.constant 4.000000e+00 : f32
    %13 = vector.broadcast %cst_5 : f32 to vector<1x8xf32>
    %14 = arith.subf %13, %11 : vector<1x8xf32>
    %cst_6 = arith.constant 0xFF800000 : f32
    %15 = vector.broadcast %cst_6 : f32 to vector<256x8xf32>
    %16 = arith.select %4, %15, %0 : vector<256x8xi1>, vector<256x8xf32>
    %cst_7 = arith.constant 0xFF800000 : f32
    %c0_i32 = arith.constant 0 : i32
    %cst_8 = arith.constant dense<0xFF800000> : vector<8xf32>
    %17 = vector.multi_reduction <maximumf>, %16, %cst_8 [0] : vector<256x8xf32> to vector<8xf32>
    %18 = vector.shape_cast %17 : vector<8xf32> to vector<1x8xf32>
    %19 = vector.broadcast %18 : vector<1x8xf32> to vector<256x8xf32>
    %20 = arith.cmpf oeq, %16, %19 : vector<256x8xf32>
    %cst_9 = arith.constant 1.000000e+00 : f32
    %cst_10 = arith.constant 0.000000e+00 : f32
    %21 = vector.broadcast %cst_9 : f32 to vector<256x8xf32>
    %22 = vector.broadcast %cst_10 : f32 to vector<256x8xf32>
    %23 = arith.select %20, %21, %22 : vector<256x8xi1>, vector<256x8xf32>
    %cst_11 = arith.constant dense<0.000000e+00> : vector<8xf32>
    %24 = vector.multi_reduction <add>, %23, %cst_11 [0] : vector<256x8xf32> to vector<8xf32>
    %25 = vector.shape_cast %24 : vector<8xf32> to vector<1x8xf32>
    %26 = arith.minimumf %25, %14 : vector<1x8xf32>
    %cst_12 = arith.constant 0.000000e+00 : f32
    %27 = vector.broadcast %cst_12 : f32 to vector<1x8xf32>
    %28 = arith.cmpf ogt, %26, %27 : vector<1x8xf32>
    %29 = arith.mulf %26, %18 : vector<1x8xf32>
    %cst_13 = arith.constant 0.000000e+00 : f32
    %30 = vector.broadcast %cst_13 : f32 to vector<1x8xf32>
    %31 = arith.select %28, %29, %30 : vector<1x8xi1>, vector<1x8xf32>
    %32 = arith.addf %12, %31 : vector<1x8xf32>
    %33 = arith.subf %14, %26 : vector<1x8xf32>
    %34 = vector.broadcast %cst_7 : f32 to vector<256x8xf32>
    %35 = arith.select %20, %34, %16 : vector<256x8xi1>, vector<256x8xf32>
    %c1_i32 = arith.constant 1 : i32
    %cst_14 = arith.constant dense<0xFF800000> : vector<8xf32>
    %36 = vector.multi_reduction <maximumf>, %35, %cst_14 [0] : vector<256x8xf32> to vector<8xf32>
    %37 = vector.shape_cast %36 : vector<8xf32> to vector<1x8xf32>
    %38 = vector.broadcast %37 : vector<1x8xf32> to vector<256x8xf32>
    %39 = arith.cmpf oeq, %35, %38 : vector<256x8xf32>
    %cst_15 = arith.constant 1.000000e+00 : f32
    %cst_16 = arith.constant 0.000000e+00 : f32
    %40 = vector.broadcast %cst_15 : f32 to vector<256x8xf32>
    %41 = vector.broadcast %cst_16 : f32 to vector<256x8xf32>
    %42 = arith.select %39, %40, %41 : vector<256x8xi1>, vector<256x8xf32>
    %cst_17 = arith.constant dense<0.000000e+00> : vector<8xf32>
    %43 = vector.multi_reduction <add>, %42, %cst_17 [0] : vector<256x8xf32> to vector<8xf32>
    %44 = vector.shape_cast %43 : vector<8xf32> to vector<1x8xf32>
    %45 = arith.minimumf %44, %33 : vector<1x8xf32>
    %cst_18 = arith.constant 0.000000e+00 : f32
    %46 = vector.broadcast %cst_18 : f32 to vector<1x8xf32>
    %47 = arith.cmpf ogt, %45, %46 : vector<1x8xf32>
    %48 = arith.mulf %45, %37 : vector<1x8xf32>
    %cst_19 = arith.constant 0.000000e+00 : f32
    %49 = vector.broadcast %cst_19 : f32 to vector<1x8xf32>
    %50 = arith.select %47, %48, %49 : vector<1x8xi1>, vector<1x8xf32>
    %51 = arith.addf %32, %50 : vector<1x8xf32>
    %52 = arith.subf %33, %45 : vector<1x8xf32>
    %53 = vector.broadcast %cst_7 : f32 to vector<256x8xf32>
    %54 = arith.select %39, %53, %35 : vector<256x8xi1>, vector<256x8xf32>
    %c2_i32 = arith.constant 2 : i32
    %cst_20 = arith.constant dense<0xFF800000> : vector<8xf32>
    %55 = vector.multi_reduction <maximumf>, %54, %cst_20 [0] : vector<256x8xf32> to vector<8xf32>
    %56 = vector.shape_cast %55 : vector<8xf32> to vector<1x8xf32>
    %57 = vector.broadcast %56 : vector<1x8xf32> to vector<256x8xf32>
    %58 = arith.cmpf oeq, %54, %57 : vector<256x8xf32>
    %cst_21 = arith.constant 1.000000e+00 : f32
    %cst_22 = arith.constant 0.000000e+00 : f32
    %59 = vector.broadcast %cst_21 : f32 to vector<256x8xf32>
    %60 = vector.broadcast %cst_22 : f32 to vector<256x8xf32>
    %61 = arith.select %58, %59, %60 : vector<256x8xi1>, vector<256x8xf32>
    %cst_23 = arith.constant dense<0.000000e+00> : vector<8xf32>
    %62 = vector.multi_reduction <add>, %61, %cst_23 [0] : vector<256x8xf32> to vector<8xf32>
    %63 = vector.shape_cast %62 : vector<8xf32> to vector<1x8xf32>
    %64 = arith.minimumf %63, %52 : vector<1x8xf32>
    %cst_24 = arith.constant 0.000000e+00 : f32
    %65 = vector.broadcast %cst_24 : f32 to vector<1x8xf32>
    %66 = arith.cmpf ogt, %64, %65 : vector<1x8xf32>
    %67 = arith.mulf %64, %56 : vector<1x8xf32>
    %cst_25 = arith.constant 0.000000e+00 : f32
    %68 = vector.broadcast %cst_25 : f32 to vector<1x8xf32>
    %69 = arith.select %66, %67, %68 : vector<1x8xi1>, vector<1x8xf32>
    %70 = arith.addf %51, %69 : vector<1x8xf32>
    %71 = arith.subf %52, %64 : vector<1x8xf32>
    %72 = vector.broadcast %cst_7 : f32 to vector<256x8xf32>
    %73 = arith.select %58, %72, %54 : vector<256x8xi1>, vector<256x8xf32>
    %cst_26 = arith.constant 4.000000e+00 : f32
    %74 = vector.broadcast %cst_26 : f32 to vector<1x8xf32>
    %75 = arith.divf %70, %74 : vector<1x8xf32>
    %c0_27 = arith.constant 0 : index
    %c0_28 = arith.constant 0 : index
    %76 = vector.load %arg2[%c0_27, %c0_28] : memref<1x8xf32, #tpu.memory_space<vmem>>, vector<1x8xf32>
    tpu.vector_store %arg2[%c0_27, %c0_28], %75 {strides = array<i32>} : memref<1x8xf32, #tpu.memory_space<vmem>>, vector<1x8xf32>,
    return
  }
  func.func @transform_0(%arg0: i32) -> (i32, i32) {
    %c0_i32 = arith.constant 0 : i32
    %c0_i32_0 = arith.constant 0 : i32
    return %c0_i32, %arg0 : i32, i32
  }
  func.func @transform_1(%arg0: i32) -> (i32, i32) {
    %c0_i32 = arith.constant 0 : i32
    %c0_i32_0 = arith.constant 0 : i32
    return %c0_i32, %arg0 : i32, i32
  }
}

</mosaic_0001>

<bundles_post_ra>
// kernel: tpu_custom_call.1
= control target key start
LH: loop header
LB: loop body
LE: loop exit
PB: predicated region body
PF: predicated region fallthrough
CT: control target
= control target key end

     0   :  { %6 = vsyncpa [#allocation3], 0  ;;  %vm2948_vm0 = vcmask 64512   ;;  %s2946_s0 = inlined_call_operand.vmem [shape: f32[256,8], index: 0, kind: input, shape index: {}]   ;;  %s2947_s1 = inlined_call_operand.hbm [shape: f32[1,8], index: 1, kind: output, shape index: {}]  }
   0x1   :  { %v1025_v0 = vld [vmem:[%s2946_s0] sm:$0xff]  ;;  %v1030_v1 = vld [vmem:[%s2946_s0 + $0x8] sm:$0xff]  ;;  %v1035_v2 = vld [vmem:[%s2946_s0 + $0x10] sm:$0xff] }
   0x2   :  { %v1040_v3 = vld [vmem:[%s2946_s0 + $0x18] sm:$0xff]  ;;  %v1045_v4 = vld [vmem:[%s2946_s0 + $0x20] sm:$0xff]  ;;  %v42_v5 = vsel %vm2948_vm0, %v1025_v0, -inf  ;;  %v43_v6 = vsel %vm2948_vm0, %v1030_v1, -inf  ;;  %v1054_v7 = vld [vmem:[%s2946_s0 + $0x28] sm:$0xff]  ;;  %v44_v10 = vsel %vm2948_vm0, %v1035_v2, -inf }
   0x3   :  { %v1059_v8 = vld [vmem:[%s2946_s0 + $0x30] sm:$0xff]  ;;  %v1064_v9 = vld [vmem:[%s2946_s0 + $0x38] sm:$0xff]  ;;  %v45_v11 = vsel %vm2948_vm0, %v1040_v3, -inf  ;;  %v46_v12 = vsel %vm2948_vm0, %v1045_v4, -inf  ;;  %v1075_v13 = vld [vmem:[%s2946_s0 + $0x40] sm:$0xff]  ;;  %v48_v17 = vsel %vm2948_vm0, %v1054_v7, -inf }
   0x4   :  { %v1080_v14 = vld [vmem:[%s2946_s0 + $0x48] sm:$0xff]  ;;  %v1085_v15 = vld [vmem:[%s2946_s0 + $0x50] sm:$0xff]  ;;  %v47_v16 = vmax.f32 %v42_v5, %v46_v12  ;;  %v50_v18 = vsel %vm2948_vm0, %v1059_v8, -inf  ;;  %v52_v19 = vsel %vm2948_vm0, %v1064_v9, -inf  ;;  %v1096_v20 = vld [vmem:[%s2946_s0 + $0x58] sm:$0xff]  ;;  %v49_v23 = vmax.f32 %v43_v6, %v48_v17 }
   0x5   :  { %v1101_v21 = vld [vmem:[%s2946_s0 + $0x60] sm:$0xff]  ;;  %v1106_v22 = vld [vmem:[%s2946_s0 + $0x68] sm:$0xff]  ;;  %v51_v24 = vmax.f32 %v44_v10, %v50_v18  ;;  %v53_v25 = vmax.f32 %v45_v11, %v52_v19  ;;  %v54_v26 = vsel %vm2948_vm0, %v1075_v13, -inf  ;;  %v1113_v27 = vld [vmem:[%s2946_s0 + $0x70] sm:$0xff]  ;;  %v56_v31 = vsel %vm2948_vm0, %v1080_v14, -inf }
   0x6   :  { %v1118_v28 = vld [vmem:[%s2946_s0 + $0x78] sm:$0xff]  ;;  %v1123_v29 = vld [vmem:[%s2946_s0 + $0x80] sm:$0xff]  ;;  %v55_v30 = vmax.f32 %v47_v16, %v54_v26  ;;  %v58_v32 = vsel %vm2948_vm0, %v1085_v15, -inf  ;;  %v60_v33 = vsel %vm2948_vm0, %v1096_v20, -inf  ;;  %v1134_v34 = vld [vmem:[%s2946_s0 + $0x88] sm:$0xff]  ;;  %v57_v37 = vmax.f32 %v49_v23, %v56_v31 }
   0x7   :  { %v1139_v35 = vld [vmem:[%s2946_s0 + $0x90] sm:$0xff]  ;;  %v1144_v36 = vld [vmem:[%s2946_s0 + $0x98] sm:$0xff]  ;;  %v59_v38 = vmax.f32 %v51_v24, %v58_v32  ;;  %v61_v39 = vmax.f32 %v53_v25, %v60_v33  ;;  %v62_v40 = vsel %vm2948_vm0, %v1101_v21, -inf  ;;  %v1151_v41 = vld [vmem:[%s2946_s0 + $0xa0] sm:$0xff]  ;;  %v64_v43 = vsel %vm2948_vm0, %v1106_v22, -inf }
   0x8   :  { %v63_v42 = vmax.f32 %v55_v30, %v62_v40  ;;  %v66_v44 = vsel %vm2948_vm0, %v1113_v27, -inf  ;;  %v68_v45 = vsel %vm2948_vm0, %v1118_v28, -inf  ;;  %v1162_v46 = vld [vmem:[%s2946_s0 + $0xa8] sm:$0xff]  ;;  %v1167_v47 = vld [vmem:[%s2946_s0 + $0xb0] sm:$0xff]  ;;  %v1172_v48 = vld [vmem:[%s2946_s0 + $0xb8] sm:$0xff]  ;;  %v65_v49 = vmax.f32 %v57_v37, %v64_v43 }
   0x9   :  { %v67_v50 = vmax.f32 %v59_v38, %v66_v44  ;;  %v69_v51 = vmax.f32 %v61_v39, %v68_v45  ;;  %v70_v52 = vsel %vm2948_vm0, %v1123_v29, -inf  ;;  %v1179_v53 = vld [vmem:[%s2946_s0 + $0xc0] sm:$0xff]  ;;  %v72_v55 = vsel %vm2948_vm0, %v1134_v34, -inf  ;;  %v1190_v58 = vld [vmem:[%s2946_s0 + $0xc8] sm:$0xff]  ;;  %v1195_v59 = vld [vmem:[%s2946_s0 + $0xd0] sm:$0xff] }
   0xa   :  { %v71_v54 = vmax.f32 %v63_v42, %v70_v52  ;;  %v74_v56 = vsel %vm2948_vm0, %v1139_v35, -inf  ;;  %v76_v57 = vsel %vm2948_vm0, %v1144_v36, -inf  ;;  %v1200_v60 = vld [vmem:[%s2946_s0 + $0xd8] sm:$0xff]  ;;  %v73_v61 = vmax.f32 %v65_v49, %v72_v55  ;;  %v1207_v6 = vld [vmem:[%s2946_s0 + $0xe0] sm:$0xff]  ;;  %v1218_v17 = vld [vmem:[%s2946_s0 + $0xe8] sm:$0xff] }
   0xb   :  { %v75_v62 = vmax.f32 %v67_v50, %v74_v56  ;;  %v77_v63 = vmax.f32 %v69_v51, %v76_v57  ;;  %v78_v5 = vsel %vm2948_vm0, %v1151_v41, -inf  ;;  %v80_v11 = vsel %vm2948_vm0, %v1162_v46, -inf  ;;  %v1223_v18 = vld [vmem:[%s2946_s0 + $0xf0] sm:$0xff]  ;;  %v1228_v19 = vld [vmem:[%s2946_s0 + $0xf8] sm:$0xff]  ;;  %s1011_s0 = smov [#allocation2]  }
   0xc   :  { %v79_v10 = vmax.f32 %v71_v54, %v78_v5  ;;  %v82_v12 = vsel %vm2948_vm0, %v1167_v47, -inf  ;;  %v84_v16 = vsel %vm2948_vm0, %v1172_v48, -inf  ;;  %3023 = vst [vmem:[#allocation5_spill] sm:$0xff] %v1223_v18  ;;  %3024 = vst [vmem:[#allocation6_spill] sm:$0xff] %v1228_v19  ;;  %v81_v23 = vmax.f32 %v73_v61, %v80_v11  ;;  %s976_s12 = sshll.u32 %s1011_s0, 4  ;;  %s977_s12 = int_to_ptr.vmem [resolvable:$true] %s976_s12 }
   0xd   :  { %v83_v24 = vmax.f32 %v75_v62, %v82_v12  ;;  %v85_v25 = vmax.f32 %v77_v63, %v84_v16  ;;  %v86_v26 = vsel %vm2948_vm0, %v1179_v53, -inf  ;;  %v88_v31 = vsel %vm2948_vm0, %v1190_v58, -inf  ;;  %s986_s13 = scalar_lea.vmem %s977_s12, 16  ;;  %s990_s14 = scalar_lea.vmem %s977_s12, 32 }
   0xe   :  { %v87_v30 = vmax.f32 %v79_v10, %v86_v26  ;;  %v90_v32 = vsel %vm2948_vm0, %v1195_v59, -inf  ;;  %v92_v33 = vsel %vm2948_vm0, %v1200_v60, -inf  ;;  %v89_v37 = vmax.f32 %v81_v23, %v88_v31  ;;  %p987_p0 = scmp.ne.s32.totalorder %s977_s12, %s986_s13  ;;  %p991_p1 = scmp.lt.s32.totalorder %s977_s12, %s977_s12 }
   0xf   :  { %v91_v38 = vmax.f32 %v83_v24, %v90_v32  ;;  %v93_v39 = vmax.f32 %v85_v25, %v92_v33  ;;  %v94_v40 = vsel %vm2948_vm0, %v1207_v6, -inf  ;;  %v96_v43 = vsel %vm2948_vm0, %v1218_v17, -inf  ;;  %p992_p2 = scmp.lt.s32.totalorder %s990_s14, %s986_s13 }
  0x10   :  { %v95_v42 = vmax.f32 %v87_v30, %v94_v40  ;;  %v98_v44 = vsel %vm2948_vm0, %v1223_v18, -inf  ;;  %v100_v45 = vsel %vm2948_vm0, %v1228_v19, -inf  ;;  %v97_v49 = vmax.f32 %v89_v37, %v96_v43 }
  0x11   :  { %v99_v50 = vmax.f32 %v91_v38, %v98_v44  ;;  %v101_v51 = vmax.f32 %v93_v39, %v100_v45  ;;  %v2958_v10 = vmov 0.0   ;;  %p993_p3 = por %p992_p2, %p991_p1 }
  0x12   :  { %v102_v52 = vmax.f32 %v95_v42, %v97_v49 }
  0x13   :  { %v103_v54 = vmax.f32 %v99_v50, %v101_v51  ;;  %p994_p4 = pnand %p993_p3, %p987_p0 }
  0x15   :  { %v104_v55 = vmax.f32 %v102_v52, %v103_v54 }
  0x17   :  { %v105_v56 = vrot.slane %v104_v55, 4 }
  0x19   :  { %v106_v57 = vmax.f32 %v104_v55, %v105_v56 }
  0x1b   :  { %v107_v61 = vrot.slane %v106_v57, 2 }
  0x1d   :  { %v108_v62 = vmax.f32 %v106_v57, %v107_v61 }
  0x1f   :  { %v109_v63 = vrot.slane %v108_v62, 1 }
  0x21   :  { %v1246_v5 = vmax.f32 %v108_v62, %v109_v63 }
  0x23   :  { %3025 = vst [vmem:[#allocation7_spill] sm:$0xff] %v1246_v5  ;;  %vm111_vm1 = vcmp.eq.f32.partialorder %v1025_v0, %v1246_v5  ;;  %vm112_vm2 = vcmp.eq.f32.partialorder %v1030_v1, %v1246_v5  ;;  %vm113_vm3 = vcmp.eq.f32.partialorder %v1035_v2, %v1246_v5  ;;  %vm2950_vm4 = vcmp.eq.f32.partialorder %v1040_v3, %v1246_v5 }
  0x24   :  { %vm2949_vm5 = vcmp.eq.f32.partialorder %v1045_v4, %v1246_v5  ;;  %vm2951_vm6 = vcmp.eq.f32.partialorder %v1054_v7, %v1246_v5  ;;  %vm2952_vm7 = vcmp.eq.f32.partialorder %v1059_v8, %v1246_v5  ;;  %vm2953_vm8 = vcmp.eq.f32.partialorder %v1064_v9, %v1246_v5 }
  0x25   :  { %vm119_vm9 = vcmp.eq.f32.partialorder %v1075_v13, %v1246_v5  ;;  %vm122_vm12 = vcmp.eq.f32.partialorder %v1096_v20, %v1246_v5  ;;  %vm123_vm13 = vcmp.eq.f32.partialorder %v1101_v21, %v1246_v5  ;;  %vm124_vm14 = vcmp.eq.f32.partialorder %v1106_v22, %v1246_v5 }
  0x26   :  { %vm2957_vm15 = vcmp.eq.f32.partialorder %v1113_v27, %v1246_v5  ;;  %v143_v11 = vsel %vm111_vm1, 1.0, %v2958_v10  ;;  %v144_v12 = vsel %vm112_vm2, 1.0, %v2958_v10  ;;  %v145_v16 = vsel %vm113_vm3, 1.0, %v2958_v10 }
  0x27   :  { %vm2955_vm10 = vcmp.eq.f32.partialorder %v1139_v35, %v1246_v5  ;;  %vm2954_vm11 = vcmp.eq.f32.partialorder %v1144_v36, %v1246_v5  ;;  %vm2956_vm0 = vcmp.eq.f32.partialorder %v1151_v41, %v1246_v5  ;;  %v146_v23 = vsel %vm2950_vm4, 1.0, %v2958_v10 }
  0x28   :  { %v147_v24 = vsel %vm2949_vm5, 1.0, %v2958_v10  ;;  %v148_v25 = vsel %vm2951_vm6, 1.0, %v2958_v10  ;;  %v149_v26 = vsel %vm2952_vm7, 1.0, %v2958_v10  ;;  %v150_v30 = vsel %vm2953_vm8, 1.0, %v2958_v10 }
  0x29   :  { %v151_v31 = vsel %vm119_vm9, 1.0, %v2958_v10  ;;  %vm3026_vm5 = vcmask 64512   ;;  %vm3029_vm7 = vcmp.eq.f32.partialorder %v1080_v14, %v1246_v5  ;;  %vm3030_vm8 = vcmp.eq.f32.partialorder %v1085_v15, %v1246_v5 }
  0x2a   :  { %v175_v32 = vsel %vm3026_vm5, %v143_v11, 0.0  ;;  %vm3027_vm4 = vmmov %vm3026_vm5  ;;  %v152_v38 = vsel %vm3029_vm7, 1.0, %v2958_v10  ;;  %v153_v39 = vsel %vm3030_vm8, 1.0, %v2958_v10  ;;  %v154_v40 = vsel %vm122_vm12, 1.0, %v2958_v10 }
  0x2b   :  { %v176_v33 = vsel %vm3027_vm4, %v144_v12, 0.0  ;;  %vm3028_vm6 = vmmov %vm3027_vm4  ;;  %v155_v43 = vsel %vm123_vm13, 1.0, %v2958_v10  ;;  %v156_v44 = vsel %vm124_vm14, 1.0, %v2958_v10  ;;  %v157_v45 = vsel %vm2957_vm15, 1.0, %v2958_v10 }
  0x2c   :  { %v178_v37 = vsel %vm3028_vm6, %v145_v16, 0.0  ;;  %v177_v42 = vadd.f32 %v176_v33, %v175_v32  ;;  %v180_v49 = vsel %vm3027_vm4, %v146_v23, 0.0  ;;  %vm3031_vm5 = vcmp.eq.f32.partialorder %v1118_v28, %v1246_v5 }
  0x2d   :  { %v158_v50 = vsel %vm3031_vm5, 1.0, %v2958_v10  ;;  %vm3032_vm6 = vcmp.eq.f32.partialorder %v1123_v29, %v1246_v5  ;;  %vm3033_vm7 = vcmp.eq.f32.partialorder %v1134_v34, %v1246_v5  ;;  %v161_v55 = vsel %vm2955_vm10, 1.0, %v2958_v10  ;;  %vm3036_vm10 = vmmov %vm3027_vm4 }
  0x2e   :  { %v159_v51 = vsel %vm3032_vm6, 1.0, %v2958_v10  ;;  %v160_v52 = vsel %vm3033_vm7, 1.0, %v2958_v10  ;;  %v179_v54 = vadd.f32 %v178_v37, %v177_v42  ;;  %v1380_v56 = vsel %vm2954_vm11, 1.0, %v2958_v10  ;;  %vm3034_vm6 = vmmov %vm3027_vm4 }
  0x2f   :  { %v1386_v57 = vsel %vm2956_vm0, 1.0, %v2958_v10  ;;  %v182_v61 = vsel %vm3034_vm6, %v147_v24, 0.0  ;;  %vm3035_vm11 = vmmov %vm3027_vm4  ;;  %v186_v11 = vsel %vm3036_vm10, %v149_v26, 0.0  ;;  %vm141_vm5 = vcmp.eq.f32.partialorder %v1223_v18, %v1246_v5 }
  0x30   :  { %v181_v62 = vadd.f32 %v180_v49, %v179_v54  ;;  %v184_v63 = vsel %vm3035_vm11, %v148_v25, 0.0  ;;  %vm3037_vm0 = vmmov %vm3027_vm4  ;;  %v1437_v42 = vsel %vm111_vm1, -inf, %v1025_v0  ;;  %vm3053_vm1 = vcmp.eq.f32.partialorder %v1045_v4, %v1246_v5 }
  0x31   :  { %v188_v12 = vsel %vm3037_vm0, %v150_v30, 0.0  ;;  %vm3038_vm4 = vmmov %vm3037_vm0  ;;  %3048 = vst [vmem:[#allocation8_spill] sm:$0xff] %v1437_v42  ;;  %v1461_v0 = vsel %vm3053_vm1, -inf, %v1045_v4  ;;  %v1485_v4 = vsel %vm119_vm9, -inf, %v1075_v13  ;;  %v1509_v13 = vsel %vm123_vm13, -inf, %v1101_v21 }
  0x32   :  { %v190_v16 = vsel %vm3038_vm4, %v151_v31, 0.0  ;;  %vm3039_vm15 = vmmov %vm3037_vm0  ;;  %v183_v26 = vadd.f32 %v182_v61, %v181_v62  ;;  %v1422_v31 = vsel %vm3038_vm4, %v158_v50, 0.0  ;;  %3054 = vst [vmem:[#allocation12_spill] sm:$0xff] %v1461_v0  ;;  %vm3061_vm9 = vcmp.eq.f32.partialorder %v1113_v27, %v1246_v5 }
  0x33   :  { %v192_v23 = vsel %vm3039_vm15, %v152_v38, 0.0  ;;  %vm3040_vm8 = vmmov %vm3037_vm0  ;;  %v1521_v50 = vsel %vm3061_vm9, -inf, %v1113_v27  ;;  %vm3064_vm13 = vcmp.eq.f32.partialorder %v1123_v29, %v1246_v5  ;;  %vm3070_vm1 = vcmp.eq.f32.partialorder %v1167_v47, %v1246_v5 }
  0x34   :  { %v194_v24 = vsel %vm3040_vm8, %v153_v39, 0.0  ;;  %vm3041_vm11 = vmmov %vm3037_vm0  ;;  %vm142_vm0 = vcmp.eq.f32.partialorder %v1228_v19, %v1246_v5  ;;  %v1533_v21 = vsel %vm3064_vm13, -inf, %v1123_v29  ;;  %vm3076_vm9 = vcmp.eq.f32.partialorder %v1207_v6, %v1246_v5 }
  0x35   :  { %v196_v25 = vsel %vm3041_vm11, %v154_v40, 0.0  ;;  %vm3042_vm10 = vmmov %vm3038_vm4  ;;  %v185_v40 = vadd.f32 %v184_v63, %v183_v26  ;;  %v1605_v62 = vsel %vm3076_vm9, -inf, %v1207_v6  ;;  %vm3082_vm13 = vcmask 64512  }
  0x36   :  { %v1413_v30 = vsel %vm3042_vm10, %v155_v43, 0.0  ;;  %vm3043_vm6 = vmmov %vm3038_vm4  ;;  %v1443_v43 = vsel %vm112_vm2, -inf, %v1030_v1  ;;  %vm3055_vm2 = vcmp.eq.f32.partialorder %v1054_v7, %v1246_v5  ;;  %vm3059_vm10 = vcmp.eq.f32.partialorder %v1080_v14, %v1246_v5  ;;  %3077 = vst [vmem:[#allocation15_spill] sm:$0xff] %v1605_v62 }
  0x37   :  { %v1416_v32 = vsel %vm3043_vm6, %v156_v44, 0.0  ;;  %vm3044_vm7 = vmmov %vm3038_vm4  ;;  %3049 = vst [vmem:[#allocation9_spill] sm:$0xff] %v1443_v43  ;;  %v1449_v44 = vsel %vm113_vm3, -inf, %v1035_v2  ;;  %v1467_v1 = vsel %vm3055_vm2, -inf, %v1054_v7  ;;  %vm3056_vm3 = vcmp.eq.f32.partialorder %v1059_v8, %v1246_v5 }
  0x38   :  { %v1419_v33 = vsel %vm3044_vm7, %v157_v45, 0.0  ;;  %vm3045_vm15 = vmmov %vm3038_vm4  ;;  %3050 = vst [vmem:[#allocation10_spill] sm:$0xff] %v1449_v44  ;;  %vm3051_vm7 = vcmp.eq.f32.partialorder %v1040_v3, %v1246_v5  ;;  %v1473_v2 = vsel %vm3056_vm3, -inf, %v1059_v8  ;;  %vm3057_vm6 = vcmp.eq.f32.partialorder %v1064_v9, %v1246_v5 }
  0x39   :  { %v1425_v37 = vsel %vm3045_vm15, %v159_v51, 0.0  ;;  %vm3046_vm8 = vmmov %vm3038_vm4  ;;  %v1455_v45 = vsel %vm3051_vm7, -inf, %v1040_v3  ;;  %v187_v3 = vadd.f32 %v186_v11, %v185_v40  ;;  %v1479_v49 = vsel %vm3057_vm6, -inf, %v1064_v9 }
  0x3a   :  { %v1428_v38 = vsel %vm3046_vm8, %v160_v52, 0.0  ;;  %vm3047_vm11 = vmmov %vm3038_vm4  ;;  %3052 = vst [vmem:[#allocation11_spill] sm:$0xff] %v1455_v45  ;;  %v1491_v7 = vsel %vm3059_vm10, -inf, %v1080_v14  ;;  %vm3060_vm4 = vcmp.eq.f32.partialorder %v1085_v15, %v1246_v5  ;;  %v1503_v9 = vsel %vm122_vm12, -inf, %v1096_v20 }
  0x3b   :  { %v1431_v39 = vsel %vm3047_vm11, %v161_v55, 0.0  ;;  %3058 = vst [vmem:[#allocation13_spill] sm:$0xff] %v1479_v49  ;;  %v1497_v8 = vsel %vm3060_vm4, -inf, %v1085_v15  ;;  %v1515_v14 = vsel %vm124_vm14, -inf, %v1106_v22  ;;  %v189_v15 = vadd.f32 %v188_v12, %v187_v3 }
  0x3c   :  { %vm3062_vm12 = vcmp.eq.f32.partialorder %v1118_v28, %v1246_v5  ;;  %vm3065_vm14 = vcmp.eq.f32.partialorder %v1134_v34, %v1246_v5  ;;  %vm3066_vm15 = vcmp.eq.f32.partialorder %v1139_v35, %v1246_v5  ;;  %vm3067_vm8 = vcmp.eq.f32.partialorder %v1144_v36, %v1246_v5 }
  0x3d   :  { %v1527_v20 = vsel %vm3062_vm12, -inf, %v1118_v28  ;;  %v1539_v22 = vsel %vm3065_vm14, -inf, %v1134_v34  ;;  %v1545_v27 = vsel %vm3066_vm15, -inf, %v1139_v35  ;;  %v1551_v28 = vsel %vm3067_vm8, -inf, %v1144_v36  ;;  %vm3083_vm14 = vmmov %vm3082_vm13 }
  0x3e   :  { %3063 = vst [vmem:[#allocation14_spill] sm:$0xff] %v1527_v20  ;;  %vm3068_vm11 = vcmp.eq.f32.partialorder %v1151_v41, %v1246_v5  ;;  %v191_v34 = vadd.f32 %v190_v16, %v189_v15  ;;  %vm3069_vm7 = vcmp.eq.f32.partialorder %v1162_v46, %v1246_v5  ;;  %v1569_v35 = vsel %vm3070_vm1, -inf, %v1167_v47  ;;  %vm3084_vm15 = vmmov %vm3082_vm13 }
  0x3f   :  { %v1557_v29 = vsel %vm3068_vm11, -inf, %v1151_v41  ;;  %v1563_v51 = vsel %vm3069_vm7, -inf, %v1162_v46  ;;  %vm3071_vm2 = vcmp.eq.f32.partialorder %v1172_v48, %v1246_v5  ;;  %vm3072_vm3 = vcmp.eq.f32.partialorder %v1179_v53, %v1246_v5  ;;  %vm3085_vm8 = vmmov %vm3082_vm13 }
  0x40   :  { %v1575_v36 = vsel %vm3071_vm2, -inf, %v1172_v48  ;;  %v1581_v41 = vsel %vm3072_vm3, -inf, %v1179_v53  ;;  %vm3073_vm6 = vcmp.eq.f32.partialorder %v1190_v58, %v1246_v5  ;;  %vm3074_vm10 = vcmp.eq.f32.partialorder %v1195_v59, %v1246_v5  ;;  %vm3086_vm11 = vmmov %vm3085_vm8 }
  0x41   :  { %v1587_v52 = vsel %vm3073_vm6, -inf, %v1190_v58  ;;  %v1593_v54 = vsel %vm3074_vm10, -inf, %v1195_v59  ;;  %vm3075_vm4 = vcmp.eq.f32.partialorder %v1200_v60, %v1246_v5  ;;  %v193_v61 = vadd.f32 %v192_v23, %v191_v34  ;;  %vm3087_vm7 = vmmov %vm3085_vm8 }
  0x42   :  { %v1599_v55 = vsel %vm3075_vm4, -inf, %v1200_v60  ;;  %vm3078_vm12 = vcmp.eq.f32.partialorder %v1218_v17, %v1246_v5  ;;  %v1617_v11 = vsel %vm141_vm5, -inf, %v1223_v18  ;;  %v1623_v12 = vsel %vm142_vm0, -inf, %v1228_v19  ;;  %vm3088_vm1 = vmmov %vm3087_vm7 }
  0x43   :  { %v1611_v63 = vsel %vm3078_vm12, -inf, %v1218_v17  ;;  %3080 = vst [vmem:[#allocation17_spill] sm:$0xff] %v1617_v11  ;;  %3081 = vst [vmem:[#allocation18_spill] sm:$0xff] %v1623_v12  ;;  %v279_v16 = vsel %vm3082_vm13, %v1437_v42, -inf  ;;  %v280_v23 = vsel %vm3083_vm14, %v1443_v43, -inf  ;;  %v281_v26 = vsel %vm3084_vm15, %v1449_v44, -inf }
  0x44   :  { %3079 = vst [vmem:[#allocation16_spill] sm:$0xff] %v1611_v63  ;;  %v195_v40 = vadd.f32 %v194_v24, %v193_v61  ;;  %v282_v3 = vsel %vm3085_vm8, %v1455_v45, -inf  ;;  %v283_v15 = vsel %vm3086_vm11, %v1461_v0, -inf  ;;  %v285_v34 = vsel %vm3087_vm7, %v1467_v1, -inf  ;;  %vm3089_vm2 = vmmov %vm3088_vm1 }
  0x45   :  { %v284_v10 = vmax.f32 %v279_v16, %v283_v15  ;;  %v286_v19 = vmax.f32 %v280_v23, %v285_v34  ;;  %v287_v42 = vsel %vm3088_vm1, %v1473_v2, -inf  ;;  %v289_v43 = vsel %vm3089_vm2, %v1479_v49, -inf  ;;  %vm3090_vm3 = vmmov %vm3088_vm1 }
  0x46   :  { %v197_v18 = vadd.f32 %v196_v25, %v195_v40  ;;  %v288_v44 = vmax.f32 %v281_v26, %v287_v42  ;;  %v290_v24 = vmax.f32 %v282_v3, %v289_v43  ;;  %v291_v61 = vsel %vm3090_vm3, %v1485_v4, -inf  ;;  %vm3091_vm6 = vmmov %vm3088_vm1 }
  0x47   :  { %v292_v45 = vmax.f32 %v284_v10, %v291_v61  ;;  %v293_v0 = vsel %vm3091_vm6, %v1491_v7, -inf  ;;  %vm3092_vm10 = vmmov %vm3088_vm1 }
  0x48   :  { %v295_v16 = vsel %vm3092_vm10, %v1497_v8, -inf  ;;  %vm3093_vm4 = vmmov %vm3088_vm1  ;;  %v199_v15 = vadd.f32 %v1413_v30, %v197_v18  ;;  %v294_v34 = vmax.f32 %v286_v19, %v293_v0 }
  0x49   :  { %v297_v23 = vsel %vm3093_vm4, %v1503_v9, -inf  ;;  %v296_v49 = vmax.f32 %v288_v44, %v295_v16  ;;  %vm3094_vm9 = vmmov %vm3088_vm1 }
  0x4a   :  { %v298_v25 = vmax.f32 %v290_v24, %v297_v23  ;;  %v299_v42 = vsel %vm3094_vm9, %v1509_v13, -inf  ;;  %vm3095_vm12 = vmmov %vm3088_vm1  ;;  %v201_v40 = vadd.f32 %v1416_v32, %v199_v15 }
  0x4b   :  { %v301_v10 = vsel %vm3095_vm12, %v1515_v14, -inf  ;;  %vm3096_vm13 = vmmov %vm3088_vm1  ;;  %v300_v3 = vmax.f32 %v292_v45, %v299_v42  ;;  %v315_v45 = vsel %vm3088_vm1, %v1557_v29, -inf }
  0x4c   :  { %v303_v43 = vsel %vm3096_vm13, %v1521_v50, -inf  ;;  %vm3097_vm14 = vmmov %vm3088_vm1  ;;  %v302_v61 = vmax.f32 %v294_v34, %v301_v10  ;;  %v203_v24 = vadd.f32 %v1419_v33, %v201_v40 }
  0x4d   :  { %v305_v26 = vsel %vm3097_vm14, %v1527_v20, -inf  ;;  %v304_v18 = vmax.f32 %v296_v49, %v303_v43  ;;  %vm3098_vm15 = vmmov %vm3088_vm1 }
  0x4e   :  { %v306_v19 = vmax.f32 %v298_v25, %v305_v26  ;;  %v307_v30 = vsel %vm3098_vm15, %v1533_v21, -inf  ;;  %vm3099_vm8 = vmmov %vm3088_vm1  ;;  %v205_v34 = vadd.f32 %v1422_v31, %v203_v24 }
  0x4f   :  { %v309_v44 = vsel %vm3099_vm8, %v1539_v22, -inf  ;;  %vm3100_vm11 = vmmov %vm3088_vm1  ;;  %v308_v16 = vmax.f32 %v300_v3, %v307_v30 }
  0x50   :  { %v311_v0 = vsel %vm3100_vm11, %v1545_v27, -inf  ;;  %v310_v23 = vmax.f32 %v302_v61, %v309_v44  ;;  %vm3101_vm7 = vmmov %vm3088_vm1  ;;  %v207_v3 = vadd.f32 %v1425_v37, %v205_v34 }
  0x51   :  { %v312_v20 = vmax.f32 %v304_v18, %v311_v0  ;;  %v313_v32 = vsel %vm3101_vm7, %v1551_v28, -inf  ;;  %vm3102_vm2 = vmmov %vm3088_vm1  ;;  %v316_v42 = vmax.f32 %v308_v16, %v315_v45  ;;  %vm3115_vm7 = vcmp.eq.f32.partialorder %v1162_v46, %v1246_v5 }
  0x52   :  { %v317_v49 = vsel %vm3102_vm2, %v1563_v51, -inf  ;;  %vm3103_vm3 = vmmov %vm3088_vm1  ;;  %v314_v25 = vmax.f32 %v306_v19, %v313_v32  ;;  %v209_v0 = vadd.f32 %v1428_v38, %v207_v3  ;;  %vm3116_vm2 = vcmp.eq.f32.partialorder %v1167_v47, %v1246_v5 }
  0x53   :  { %v319_v15 = vsel %vm3103_vm3, %v1569_v35, -inf  ;;  %v318_v33 = vmax.f32 %v310_v23, %v317_v49  ;;  %vm3104_vm6 = vmmov %vm3088_vm1 }
  0x54   :  { %v320_v10 = vmax.f32 %v312_v20, %v319_v15  ;;  %v321_v43 = vsel %vm3104_vm6, %v1575_v36, -inf  ;;  %vm3105_vm10 = vmmov %vm3088_vm1  ;;  %v3114_v15 = vmov 0.0   ;;  %v211_v38 = vadd.f32 %v1431_v39, %v209_v0 }
  0x55   :  { %v323_v26 = vsel %vm3105_vm10, %v1581_v41, -inf  ;;  %vm3106_vm4 = vmmov %vm3088_vm1  ;;  %v322_v61 = vmax.f32 %v314_v25, %v321_v43  ;;  %v164_v34 = vsel %vm3115_vm7, 1.0, %v3114_v15  ;;  %vm3118_vm6 = vcmp.eq.f32.partialorder %v1172_v48, %v1246_v5 }
  0x56   :  { %v325_v40 = vsel %vm3106_vm4, %v1587_v52, -inf  ;;  %v324_v18 = vmax.f32 %v316_v42, %v323_v26  ;;  %vm3107_vm9 = vmmov %vm3088_vm1  ;;  %v166_v46 = vsel %vm3118_vm6, 1.0, %v3114_v15  ;;  %vm3120_vm4 = vcmp.eq.f32.partialorder %v1179_v53, %v1246_v5 }
  0x57   :  { %v326_v30 = vmax.f32 %v318_v33, %v325_v40  ;;  %v327_v31 = vsel %vm3107_vm9, %v1593_v54, -inf  ;;  %vm3108_vm12 = vmmov %vm3088_vm1  ;;  %v214_v33 = vsel %vm3088_vm1, %v1386_v57, 0.0  ;;  %v167_v57 = vsel %vm3120_vm4, 1.0, %v3114_v15 }
  0x58   :  { %v329_v20 = vsel %vm3108_vm12, %v1599_v55, -inf  ;;  %vm3109_vm13 = vmmov %vm3088_vm1  ;;  %v328_v24 = vmax.f32 %v320_v10, %v327_v31  ;;  %v165_v10 = vsel %vm3116_vm2, 1.0, %v3114_v15  ;;  %vm3122_vm12 = vcmp.eq.f32.partialorder %v1190_v58, %v1246_v5 }
  0x59   :  { %v331_v19 = vsel %vm3109_vm13, %v1605_v62, -inf  ;;  %vm3110_vm14 = vmmov %vm3088_vm1  ;;  %v330_v16 = vmax.f32 %v322_v61, %v329_v20  ;;  %v168_v31 = vsel %vm3122_vm12, 1.0, %v3114_v15  ;;  %vm3128_vm7 = vcmp.eq.f32.partialorder %v1207_v6, %v1246_v5 }
  0x5a   :  { %v333_v44 = vsel %vm3110_vm14, %v1611_v63, -inf  ;;  %v332_v37 = vmax.f32 %v324_v18, %v331_v19  ;;  %vm3111_vm15 = vmmov %vm3088_vm1  ;;  %vm3124_vm14 = vcmp.eq.f32.partialorder %v1195_v59, %v1246_v5  ;;  %vm3129_vm2 = vcmp.eq.f32.partialorder %v1218_v17, %v1246_v5 }
  0x5b   :  { %v212_v23 = vsel %vm3111_vm15, %v1380_v56, 0.0  ;;  %v334_v32 = vmax.f32 %v326_v30, %v333_v44  ;;  %vm3112_vm8 = vmmov %vm3088_vm1  ;;  %v169_v44 = vsel %vm3124_vm14, 1.0, %v3114_v15 }
  0x5c   :  { %v335_v45 = vsel %vm3112_vm8, %v1617_v11, -inf  ;;  %vm3113_vm11 = vmmov %vm3088_vm1  ;;  %v213_v43 = vadd.f32 %v212_v23, %v211_v38  ;;  %vm3126_vm8 = vcmp.eq.f32.partialorder %v1200_v60, %v1246_v5  ;;  %v171_v23 = vsel %vm3128_vm7, 1.0, %v3114_v15 }
  0x5d   :  { %v337_v49 = vsel %vm3113_vm11, %v1623_v12, -inf  ;;  %v336_v25 = vmax.f32 %v328_v24, %v335_v45  ;;  %v339_v56 = vmax.f32 %v332_v37, %v334_v32  ;;  %vm3117_vm3 = vmmov %vm3088_vm1  ;;  %v170_v24 = vsel %vm3126_vm8, 1.0, %v3114_v15 }
  0x5e   :  { %v338_v42 = vmax.f32 %v330_v16, %v337_v49  ;;  %v216_v40 = vsel %vm3117_vm3, %v164_v34, 0.0  ;;  %v215_v39 = vadd.f32 %v214_v33, %v213_v43  ;;  %vm3119_vm10 = vmmov %vm3088_vm1  ;;  %v228_v59 = vsel %vm3088_vm1, %v170_v24, 0.0 }
  0x5f   :  { %v218_v61 = vsel %vm3119_vm10, %v165_v10, 0.0  ;;  %vm3121_vm9 = vmmov %vm3088_vm1  ;;  %v172_v45 = vsel %vm3129_vm2, 1.0, %v3114_v15 }
  0x60   :  { %v340_v26 = vmax.f32 %v336_v25, %v338_v42  ;;  %v217_v47 = vadd.f32 %v216_v40, %v215_v39  ;;  %v220_v30 = vsel %vm3121_vm9, %v166_v46, 0.0  ;;  %vm3123_vm13 = vmmov %vm3088_vm1  ;;  %v173_v25 = vsel %vm141_vm5, 1.0, %v3114_v15 }
  0x61   :  { %v222_v20 = vsel %vm3123_vm13, %v167_v57, 0.0  ;;  %vm3125_vm15 = vmmov %vm3088_vm1  ;;  %v3137_v57 = vld [vmem:[#allocation9_spill] sm:$0xff] }
  0x62   :  { %v341_v3 = vmax.f32 %v339_v56, %v340_v26  ;;  %v219_v48 = vadd.f32 %v218_v61, %v217_v47  ;;  %v224_v0 = vsel %vm3125_vm15, %v168_v31, 0.0  ;;  %vm3127_vm11 = vmmov %vm3088_vm1  ;;  %v174_v56 = vsel %vm142_vm0, 1.0, %v3114_v15  ;;  %v3136_v61 = vld [vmem:[#allocation8_spill] sm:$0xff]  ;;  %v3138_v47 = vld [vmem:[#allocation10_spill] sm:$0xff] }
  0x63   :  { %v226_v58 = vsel %vm3127_vm11, %v169_v44, 0.0  ;;  %vm3130_vm3 = vmmov %vm3088_vm1  ;;  %v3141_v31 = vld [vmem:[#allocation13_spill] sm:$0xff] }
  0x64   :  { %v342_v18 = vrot.slane %v341_v3, 4  ;;  %v221_v53 = vadd.f32 %v220_v30, %v219_v48  ;;  %v230_v60 = vsel %vm3130_vm3, %v171_v23, 0.0  ;;  %vm3132_vm6 = vmmov %vm3088_vm1  ;;  %v3140_v30 = vld [vmem:[#allocation12_spill] sm:$0xff]  ;;  %v3142_v48 = vld [vmem:[#allocation14_spill] sm:$0xff] }
  0x65   :  { %v232_v6 = vsel %vm3132_vm6, %v172_v45, 0.0  ;;  %vm3134_vm10 = vmmov %vm3088_vm1 }
  0x66   :  { %v343_v19 = vmax.f32 %v341_v3, %v342_v18  ;;  %v223_v16 = vadd.f32 %v222_v20, %v221_v53  ;;  %v234_v17 = vsel %vm3134_vm10, %v173_v25, 0.0  ;;  %vm3135_vm4 = vmmov %vm3088_vm1  ;;  %v3139_v18 = vld [vmem:[#allocation11_spill] sm:$0xff] }
  0x67   :  { %v236_v40 = vsel %vm3135_vm4, %v174_v56, 0.0 }
  0x68   :  { %v344_v37 = vrot.slane %v343_v19, 2  ;;  %v225_v32 = vadd.f32 %v224_v0, %v223_v16 }
  0x6a   :  { %v227_v49 = vadd.f32 %v226_v58, %v225_v32  ;;  %v345_v34 = vmax.f32 %v343_v19, %v344_v37 }
  0x6c   :  { %v229_v42 = vadd.f32 %v228_v59, %v227_v49  ;;  %v346_v43 = vrot.slane %v345_v34, 1 }
  0x6e   :  { %v231_v10 = vadd.f32 %v230_v60, %v229_v42  ;;  %v1755_v39 = vmax.f32 %v345_v34, %v346_v43 }
  0x70   :  { %v233_v26 = vadd.f32 %v232_v6, %v231_v10  ;;  %vm2976_vm5 = vcmp.eq.f32.partialorder %v3136_v61, %v1755_v39  ;;  %vm2977_vm9 = vcmp.eq.f32.partialorder %v3137_v57, %v1755_v39  ;;  %vm2978_vm0 = vcmp.eq.f32.partialorder %v3138_v47, %v1755_v39 }
  0x71   :  { %vm351_vm12 = vcmp.eq.f32.partialorder %v3139_v18, %v1755_v39  ;;  %vm2979_vm13 = vcmp.eq.f32.partialorder %v3140_v30, %v1755_v39  ;;  %vm353_vm14 = vcmp.eq.f32.partialorder %v1467_v1, %v1755_v39  ;;  %vm354_vm15 = vcmp.eq.f32.partialorder %v1473_v2, %v1755_v39 }
  0x72   :  { %v235_v46 = vadd.f32 %v234_v17, %v233_v26  ;;  %vm355_vm8 = vcmp.eq.f32.partialorder %v3141_v31, %v1755_v39  ;;  %vm356_vm11 = vcmp.eq.f32.partialorder %v1485_v4, %v1755_v39  ;;  %vm358_vm1 = vcmp.eq.f32.partialorder %v1497_v8, %v1755_v39 }
  0x73   :  { %vm359_vm2 = vcmp.eq.f32.partialorder %v1503_v9, %v1755_v39  ;;  %vm2980_vm3 = vcmp.eq.f32.partialorder %v1509_v13, %v1755_v39  ;;  %vm2985_vm7 = vcmp.eq.f32.partialorder %v1533_v21, %v1755_v39  ;;  %v380_v20 = vsel %vm2976_vm5, 1.0, %v3114_v15 }
  0x74   :  { %v1757_v3 = vadd.f32 %v236_v40, %v235_v46  ;;  %v381_v19 = vsel %vm2977_vm9, 1.0, %v3114_v15  ;;  %vm2983_vm6 = vcmp.eq.f32.partialorder %v1539_v22, %v1755_v39  ;;  %vm2982_vm10 = vcmp.eq.f32.partialorder %v1545_v27, %v1755_v39 }
  0x75   :  { %vm2981_vm4 = vcmp.eq.f32.partialorder %v1551_v28, %v1755_v39  ;;  %v382_v44 = vsel %vm2978_vm0, 1.0, %v3114_v15  ;;  %vm2984_vm9 = vcmp.eq.f32.partialorder %v1563_v51, %v1755_v39  ;;  %v383_v0 = vsel %vm351_vm12, 1.0, %v3114_v15 }
  0x76   :  { %v384_v24 = vsel %vm2979_vm13, 1.0, %v3114_v15  ;;  %v385_v16 = vsel %vm353_vm14, 1.0, %v3114_v15  ;;  %vm3143_vm0 = vcmask 64512   ;;  %v386_v23 = vsel %vm354_vm15, 1.0, %v3114_v15 }
  0x77   :  { %v412_v58 = vsel %vm3143_vm0, %v380_v20, 0.0  ;;  %vm3144_vm5 = vmmov %vm3143_vm0  ;;  %v387_v32 = vsel %vm355_vm8, 1.0, %v3114_v15  ;;  %v388_v49 = vsel %vm356_vm11, 1.0, %v3114_v15  ;;  %v390_v34 = vsel %vm358_vm1, 1.0, %v3114_v15 }
  0x78   :  { %v413_v37 = vsel %vm3144_vm5, %v381_v19, 0.0  ;;  %vm3145_vm13 = vmmov %vm3143_vm0  ;;  %vm3146_vm5 = vcmp.eq.f32.partialorder %v1491_v7, %v1755_v39  ;;  %v417_v38 = vsel %vm3143_vm0, %v383_v0, 0.0  ;;  %v391_v25 = vsel %vm359_vm2, 1.0, %v3114_v15 }
  0x79   :  { %v414_v59 = vadd.f32 %v413_v37, %v412_v58  ;;  %v415_v45 = vsel %vm3145_vm13, %v382_v44, 0.0  ;;  %v389_v60 = vsel %vm3146_vm5, 1.0, %v3114_v15  ;;  %v392_v42 = vsel %vm2980_vm3, 1.0, %v3114_v15 }
  0x7a   :  { %vm3147_vm13 = vcmp.eq.f32.partialorder %v1515_v14, %v1755_v39  ;;  %vm3148_vm5 = vcmp.eq.f32.partialorder %v1521_v50, %v1755_v39  ;;  %vm3149_vm0 = vcmp.eq.f32.partialorder %v3142_v48, %v1755_v39  ;;  %v396_v17 = vsel %vm2985_vm7, 1.0, %v3114_v15 }
  0x7b   :  { %v393_v6 = vsel %vm3147_vm13, 1.0, %v3114_v15  ;;  %v416_v33 = vadd.f32 %v415_v45, %v414_v59  ;;  %v394_v56 = vsel %vm3148_vm5, 1.0, %v3114_v15  ;;  %v395_v10 = vsel %vm3149_vm0, 1.0, %v3114_v15 }
  0x7c   :  { %vm3150_vm3 = vcmask 64512   ;;  %v397_v26 = vsel %vm2983_vm6, 1.0, %v3114_v15  ;;  %v398_v40 = vsel %vm2982_vm10, 1.0, %v3114_v15  ;;  %v399_v46 = vsel %vm2981_vm4, 1.0, %v3114_v15 }
  0x7d   :  { %v419_v43 = vsel %vm3150_vm3, %v384_v24, 0.0  ;;  %v418_v20 = vadd.f32 %v417_v38, %v416_v33  ;;  %vm3151_vm0 = vcmp.eq.f32.partialorder %v1557_v29, %v1755_v39  ;;  %v1905_v44 = vsel %vm2984_vm9, 1.0, %v3114_v15  ;;  %vm3152_vm4 = vmmov %vm3150_vm3 }
  0x7e   :  { %v1899_v19 = vsel %vm3151_vm0, 1.0, %v3114_v15  ;;  %v421_v0 = vsel %vm3152_vm4, %v385_v16, 0.0  ;;  %vm3153_vm13 = vmmov %vm3150_vm3 }
  0x7f   :  { %v423_v24 = vsel %vm3153_vm13, %v386_v23, 0.0  ;;  %v420_v58 = vadd.f32 %v419_v43, %v418_v20  ;;  %vm3154_vm6 = vmmov %vm3150_vm3  ;;  %vm377_vm13 = vcmp.eq.f32.partialorder %v1611_v63, %v1755_v39 }
  0x80   :  { %v425_v37 = vsel %vm3154_vm6, %v387_v32, 0.0  ;;  %vm3155_vm9 = vmmov %vm3150_vm3 }
  0x81   :  { %v427_v59 = vsel %vm3155_vm9, %v388_v49, 0.0  ;;  %vm3156_vm4 = vmmov %vm3150_vm3  ;;  %v422_v49 = vadd.f32 %v421_v0, %v420_v58 }
  0x82   :  { %v429_v16 = vsel %vm3156_vm4, %v389_v60, 0.0  ;;  %vm3157_vm0 = vmmov %vm3150_vm3 }
  0x83   :  { %v431_v23 = vsel %vm3157_vm0, %v390_v34, 0.0  ;;  %vm3158_vm7 = vmmov %vm3157_vm0  ;;  %v1945_v34 = vsel %vm3157_vm0, %v398_v40, 0.0 }
  0x84   :  { %v433_v45 = vsel %vm3158_vm7, %v391_v25, 0.0  ;;  %vm3159_vm10 = vmmov %vm3157_vm0 }
  0x85   :  { %v435_v38 = vsel %vm3159_vm10, %v392_v42, 0.0  ;;  %vm3160_vm6 = vmmov %vm3157_vm0  ;;  %vm3166_vm10 = vcmp.eq.f32.partialorder %v3136_v61, %v1755_v39 }
  0x86   :  { %v1930_v32 = vsel %vm3160_vm6, %v393_v6, 0.0  ;;  %vm3161_vm9 = vmmov %vm3157_vm0  ;;  %v1954_v42 = vsel %vm3166_vm10, -inf, %v3136_v61  ;;  %v424_v6 = vadd.f32 %v423_v24, %v422_v49  ;;  %vm3173_vm6 = vcmp.eq.f32.partialorder %v3140_v30, %v1755_v39 }
  0x87   :  { %v1933_v60 = vsel %vm3161_vm9, %v394_v56, 0.0  ;;  %vm3162_vm4 = vmmov %vm3157_vm0  ;;  %3167 = vst [vmem:[#allocation5_spill] sm:$0xff] %v1954_v42  ;;  %v1978_v61 = vsel %vm3173_vm6, -inf, %v3140_v30  ;;  %vm3183_vm9 = vcmp.eq.f32.partialorder %v1545_v27, %v1755_v39  ;;  %vm3187_vm10 = vcmp.eq.f32.partialorder %v1569_v35, %v1755_v39 }
  0x88   :  { %v1936_v33 = vsel %vm3162_vm4, %v395_v10, 0.0  ;;  %vm3163_vm3 = vmmov %vm3157_vm0  ;;  %3174 = vst [vmem:[#allocation10_spill] sm:$0xff] %v1978_v61  ;;  %v426_v30 = vadd.f32 %v425_v37, %v424_v6  ;;  %vm3184_vm4 = vcmp.eq.f32.partialorder %v1551_v28, %v1755_v39  ;;  %vm3190_vm6 = vcmp.eq.f32.partialorder %v1587_v52, %v1755_v39 }
  0x89   :  { %v1939_v43 = vsel %vm3163_vm3, %v396_v17, 0.0  ;;  %vm3164_vm5 = vmmov %vm3157_vm0  ;;  %vm3168_vm3 = vcmp.eq.f32.partialorder %v3137_v57, %v1755_v39  ;;  %v1972_v17 = vsel %vm351_vm12, -inf, %v3139_v18  ;;  %v1996_v18 = vsel %vm355_vm8, -inf, %v3141_v31 }
  0x8a   :  { %v1942_v20 = vsel %vm3164_vm5, %v397_v26, 0.0  ;;  %vm3165_vm7 = vmmov %vm3157_vm0  ;;  %v1960_v56 = vsel %vm3168_vm3, -inf, %v3137_v57  ;;  %vm3170_vm5 = vcmp.eq.f32.partialorder %v3138_v47, %v1755_v39  ;;  %3172 = vst [vmem:[#allocation9_spill] sm:$0xff] %v1972_v17  ;;  %v1984_v57 = vsel %vm353_vm14, -inf, %v1467_v1 }
  0x8b   :  { %v1948_v25 = vsel %vm3165_vm7, %v399_v46, 0.0  ;;  %3169 = vst [vmem:[#allocation6_spill] sm:$0xff] %v1960_v56  ;;  %v1966_v10 = vsel %vm3170_vm5, -inf, %v3138_v47  ;;  %3175 = vst [vmem:[#allocation11_spill] sm:$0xff] %v1984_v57  ;;  %v1990_v47 = vsel %vm354_vm15, -inf, %v1473_v2  ;;  %v2002_v26 = vsel %vm356_vm11, -inf, %v1485_v4 }
  0x8c   :  { %3171 = vst [vmem:[#allocation8_spill] sm:$0xff] %v1966_v10  ;;  %vm3176_vm12 = vcmp.eq.f32.partialorder %v1491_v7, %v1755_v39  ;;  %v2014_v2 = vsel %vm358_vm1, -inf, %v1497_v8  ;;  %v2020_v31 = vsel %vm359_vm2, -inf, %v1503_v9  ;;  %vm3177_vm14 = vcmp.eq.f32.partialorder %v1509_v13, %v1755_v39 }
  0x8d   :  { %v2008_v1 = vsel %vm3176_vm12, -inf, %v1491_v7  ;;  %v2026_v4 = vsel %vm3177_vm14, -inf, %v1509_v13  ;;  %vm3178_vm15 = vcmp.eq.f32.partialorder %v1515_v14, %v1755_v39  ;;  %vm3179_vm8 = vcmp.eq.f32.partialorder %v1521_v50, %v1755_v39 }
  0x8e   :  { %v2032_v7 = vsel %vm3178_vm15, -inf, %v1515_v14  ;;  %v2038_v8 = vsel %vm3179_vm8, -inf, %v1521_v50  ;;  %v428_v9 = vadd.f32 %v427_v59, %v426_v30  ;;  %vm3180_vm11 = vcmp.eq.f32.partialorder %v3142_v48, %v1755_v39 }
  0x8f   :  { %v2044_v40 = vsel %vm3180_vm11, -inf, %v3142_v48  ;;  %vm3181_vm1 = vcmp.eq.f32.partialorder %v1533_v21, %v1755_v39  ;;  %vm3182_vm2 = vcmp.eq.f32.partialorder %v1539_v22, %v1755_v39  ;;  %v2062_v50 = vsel %vm3183_vm9, -inf, %v1545_v27 }
  0x90   :  { %v2050_v13 = vsel %vm3181_vm1, -inf, %v1533_v21  ;;  %v2056_v14 = vsel %vm3182_vm2, -inf, %v1539_v22  ;;  %v2068_v48 = vsel %vm3184_vm4, -inf, %v1551_v28  ;;  %vm3185_vm0 = vcmp.eq.f32.partialorder %v1557_v29, %v1755_v39 }
  0x91   :  { %v2074_v21 = vsel %vm3185_vm0, -inf, %v1557_v29  ;;  %vm3186_vm7 = vcmp.eq.f32.partialorder %v1563_v51, %v1755_v39  ;;  %v430_v27 = vadd.f32 %v429_v16, %v428_v9  ;;  %v2086_v46 = vsel %vm3187_vm10, -inf, %v1569_v35 }
  0x92   :  { %v2080_v22 = vsel %vm3186_vm7, -inf, %v1563_v51  ;;  %vm3188_vm3 = vcmp.eq.f32.partialorder %v1575_v36, %v1755_v39  ;;  %vm3189_vm5 = vcmp.eq.f32.partialorder %v1581_v41, %v1755_v39  ;;  %v2104_v51 = vsel %vm3190_vm6, -inf, %v1587_v52 }
  0x93   :  { %v2092_v28 = vsel %vm3188_vm3, -inf, %v1575_v36  ;;  %v2098_v29 = vsel %vm3189_vm5, -inf, %v1581_v41  ;;  %vm3191_vm12 = vcmp.eq.f32.partialorder %v1593_v54, %v1755_v39  ;;  %vm3192_vm14 = vcmp.eq.f32.partialorder %v1599_v55, %v1755_v39 }
  0x94   :  { %v2110_v0 = vsel %vm3191_vm12, -inf, %v1593_v54  ;;  %v2116_v24 = vsel %vm3192_vm14, -inf, %v1599_v55  ;;  %vm3193_vm15 = vcmp.eq.f32.partialorder %v1605_v62, %v1755_v39  ;;  %v432_v37 = vadd.f32 %v431_v23, %v430_v27 }
  0x95   :  { %v2122_v58 = vsel %vm3193_vm15, -inf, %v1605_v62  ;;  %v2128_v59 = vsel %vm377_vm13, -inf, %v1611_v63  ;;  %vm3194_vm8 = vcmp.eq.f32.partialorder %v1617_v11, %v1755_v39  ;;  %vm3196_vm11 = vcmp.eq.f32.partialorder %v1623_v12, %v1755_v39 }
  0x96   :  { %v2134_v16 = vsel %vm3194_vm8, -inf, %v1617_v11  ;;  %v2140_v49 = vsel %vm3196_vm11, -inf, %v1623_v12  ;;  %vm3198_vm1 = vcmask 64512   ;;  %v434_v27 = vadd.f32 %v433_v45, %v432_v37 }
  0x97   :  { %3195 = vst [vmem:[#allocation12_spill] sm:$0xff] %v2134_v16  ;;  %3197 = vst [vmem:[#allocation13_spill] sm:$0xff] %v2140_v49  ;;  %v519_v23 = vsel %vm3198_vm1, %v1954_v42, -inf }
  0x98   :  { %vm3199_vm2 = vmmov %vm3198_vm1 }
  0x99   :  { %v520_v6 = vsel %vm3199_vm2, %v1960_v56, -inf  ;;  %vm3200_vm9 = vmmov %vm3198_vm1 }
  0x9a   :  { %v521_v30 = vsel %vm3200_vm9, %v1966_v10, -inf  ;;  %vm3201_vm4 = vmmov %vm3198_vm1  ;;  %v436_v10 = vadd.f32 %v435_v38, %v434_v27 }
  0x9b   :  { %v522_v9 = vsel %vm3201_vm4, %v1972_v17, -inf  ;;  %vm3202_vm0 = vmmov %vm3198_vm1 }
  0x9c   :  { %v523_v53 = vsel %vm3202_vm0, %v1978_v61, -inf  ;;  %vm3203_vm7 = vmmov %vm3202_vm0 }
  0x9d   :  { %v525_v5 = vsel %vm3203_vm7, %v1984_v57, -inf  ;;  %vm3204_vm10 = vmmov %vm3202_vm0  ;;  %v524_v42 = vmax.f32 %v519_v23, %v523_v53 }
  0x9e   :  { %v527_v12 = vsel %vm3204_vm10, %v1990_v47, -inf  ;;  %v526_v11 = vmax.f32 %v520_v6, %v525_v5  ;;  %vm3205_vm3 = vmmov %vm3202_vm0 }
  0x9f   :  { %v528_v63 = vmax.f32 %v521_v30, %v527_v12  ;;  %v529_v56 = vsel %vm3205_vm3, %v1996_v18, -inf  ;;  %vm3206_vm5 = vmmov %vm3202_vm0  ;;  %v438_v12 = vadd.f32 %v1930_v32, %v436_v10 }
  0xa0   :  { %v530_v62 = vmax.f32 %v522_v9, %v529_v56  ;;  %v531_v45 = vsel %vm3206_vm5, %v2002_v26, -inf  ;;  %vm3207_vm6 = vmmov %vm3202_vm0 }
  0xa1   :  { %v533_v37 = vsel %vm3207_vm6, %v2008_v1, -inf  ;;  %v532_v61 = vmax.f32 %v524_v42, %v531_v45  ;;  %vm3208_vm12 = vmmov %vm3202_vm0  ;;  %v440_v30 = vadd.f32 %v1933_v60, %v438_v12 }
  0xa2   :  { %v534_v17 = vmax.f32 %v526_v11, %v533_v37  ;;  %v535_v57 = vsel %vm3208_vm12, %v2014_v2, -inf  ;;  %vm3209_vm14 = vmmov %vm3202_vm0 }
  0xa3   :  { %v537_v5 = vsel %vm3209_vm14, %v2020_v31, -inf  ;;  %v536_v53 = vmax.f32 %v528_v63, %v535_v57  ;;  %vm3210_vm15 = vmmov %vm3202_vm0  ;;  %v442_v57 = vadd.f32 %v1936_v33, %v440_v30 }
  0xa4   :  { %v538_v23 = vmax.f32 %v530_v62, %v537_v5  ;;  %v539_v38 = vsel %vm3210_vm15, %v2026_v4, -inf  ;;  %vm3211_vm8 = vmmov %vm3202_vm0 }
  0xa5   :  { %v540_v56 = vmax.f32 %v532_v61, %v539_v38  ;;  %v541_v6 = vsel %vm3211_vm8, %v2032_v7, -inf  ;;  %vm3212_vm11 = vmmov %vm3202_vm0  ;;  %v553_v61 = vsel %vm3202_vm0, %v2068_v48, -inf }
  0xa6   :  { %v543_v11 = vsel %vm3212_vm11, %v2038_v8, -inf  ;;  %vm3213_vm1 = vmmov %vm3202_vm0  ;;  %v542_v9 = vmax.f32 %v534_v17, %v541_v6 }
  0xa7   :  { %v545_v42 = vsel %vm3213_vm1, %v2044_v40, -inf  ;;  %v544_v27 = vmax.f32 %v536_v53, %v543_v11  ;;  %vm3214_vm2 = vmmov %vm3202_vm0  ;;  %vm3227_vm1 = vcmp.eq.f32.partialorder %v1569_v35, %v1755_v39  ;;  %v3231_v35 = vrot.slane %v1757_v3, 4 }
  0xa8   :  { %v546_v32 = vmax.f32 %v538_v23, %v545_v42  ;;  %v547_v62 = vsel %vm3214_vm2, %v2050_v13, -inf  ;;  %vm3215_vm9 = vmmov %vm3202_vm0  ;;  %v444_v23 = vadd.f32 %v1939_v43, %v442_v57 }
  0xa9   :  { %v549_v63 = vsel %vm3215_vm9, %v2056_v14, -inf  ;;  %vm3216_vm4 = vmmov %vm3202_vm0  ;;  %v548_v45 = vmax.f32 %v540_v56, %v547_v62 }
  0xaa   :  { %v551_v10 = vsel %vm3216_vm4, %v2062_v50, -inf  ;;  %v550_v37 = vmax.f32 %v542_v9, %v549_v63  ;;  %v554_v17 = vmax.f32 %v546_v32, %v553_v61  ;;  %vm3217_vm7 = vmmov %vm3202_vm0  ;;  %v446_v9 = vadd.f32 %v1942_v20, %v444_v23 }
  0xab   :  { %v552_v60 = vmax.f32 %v544_v27, %v551_v10  ;;  %v555_v5 = vsel %vm3217_vm7, %v2074_v21, -inf  ;;  %vm3218_vm10 = vmmov %vm3202_vm0  ;;  %v402_v20 = vsel %vm3227_vm1, 1.0, %v3114_v15  ;;  %vm3232_vm7 = vcmp.eq.f32.partialorder %v1575_v36, %v1755_v39 }
  0xac   :  { %v557_v12 = vsel %vm3218_vm10, %v2080_v22, -inf  ;;  %vm3219_vm3 = vmmov %vm3202_vm0  ;;  %v556_v38 = vmax.f32 %v548_v45, %v555_v5  ;;  %v448_v57 = vadd.f32 %v1945_v34, %v446_v9 }
  0xad   :  { %v559_v53 = vsel %vm3219_vm3, %v2086_v46, -inf  ;;  %v558_v6 = vmax.f32 %v550_v37, %v557_v12  ;;  %vm3220_vm5 = vmmov %vm3202_vm0  ;;  %vm3234_vm3 = vcmp.eq.f32.partialorder %v1581_v41, %v1755_v39 }
  0xae   :  { %v560_v11 = vmax.f32 %v552_v60, %v559_v53  ;;  %v561_v33 = vsel %vm3220_vm5, %v2092_v28, -inf  ;;  %vm3221_vm6 = vmmov %vm3202_vm0  ;;  %v450_v53 = vadd.f32 %v1948_v25, %v448_v57  ;;  %v404_v25 = vsel %vm3234_vm3, 1.0, %v3114_v15 }
  0xaf   :  { %v563_v56 = vsel %vm3221_vm6, %v2098_v29, -inf  ;;  %vm3222_vm12 = vmmov %vm3202_vm0  ;;  %v562_v27 = vmax.f32 %v554_v17, %v561_v33  ;;  %vm3236_vm6 = vcmp.eq.f32.partialorder %v1587_v52, %v1755_v39 }
  0xb0   :  { %v565_v42 = vsel %vm3222_vm12, %v2104_v51, -inf  ;;  %vm3223_vm14 = vmmov %vm3202_vm0  ;;  %v564_v32 = vmax.f32 %v556_v38, %v563_v56  ;;  %v405_v36 = vsel %vm3236_vm6, 1.0, %v3114_v15 }
  0xb1   :  { %v567_v30 = vsel %vm3223_vm14, %v2110_v0, -inf  ;;  %v566_v43 = vmax.f32 %v558_v6, %v565_v42  ;;  %vm3224_vm15 = vmmov %vm3202_vm0  ;;  %v453_v6 = vsel %vm3202_vm0, %v1905_v44, 0.0  ;;  %vm3238_vm14 = vcmp.eq.f32.partialorder %v1593_v54, %v1755_v39 }
  0xb2   :  { %v568_v62 = vmax.f32 %v560_v11, %v567_v30  ;;  %v569_v63 = vsel %vm3224_vm15, %v2116_v24, -inf  ;;  %vm3225_vm8 = vmmov %vm3202_vm0  ;;  %v239_v11 = vadd.f32 %v3231_v35, %v1757_v3  ;;  %v406_v41 = vsel %vm3238_vm14, 1.0, %v3114_v15 }
  0xb3   :  { %v571_v10 = vsel %vm3225_vm8, %v2122_v58, -inf  ;;  %vm3226_vm11 = vmmov %vm3202_vm0  ;;  %v570_v45 = vmax.f32 %v562_v27, %v569_v63  ;;  %vm3240_vm8 = vcmp.eq.f32.partialorder %v1599_v55, %v1755_v39 }
  0xb4   :  { %v573_v61 = vsel %vm3226_vm11, %v2128_v59, -inf  ;;  %v572_v37 = vmax.f32 %v564_v32, %v571_v10  ;;  %vm3228_vm2 = vmmov %vm3202_vm0  ;;  %v240_v27 = vrot.slane %v239_v11, 2  ;;  %v407_v52 = vsel %vm3240_vm8, 1.0, %v3114_v15 }
  0xb5   :  { %v574_v60 = vmax.f32 %v566_v43, %v573_v61  ;;  %v451_v17 = vsel %vm3228_vm2, %v1899_v19, 0.0  ;;  %vm3229_vm9 = vmmov %vm3202_vm0  ;;  %v403_v19 = vsel %vm3232_vm7, 1.0, %v3114_v15 }
  0xb6   :  { %v575_v5 = vsel %vm3229_vm9, %v2134_v16, -inf  ;;  %vm3230_vm4 = vmmov %vm3202_vm0  ;;  %v452_v33 = vadd.f32 %v451_v17, %v450_v53  ;;  %v241_v61 = vadd.f32 %v240_v27, %v239_v11  ;;  %v409_v53 = vsel %vm377_vm13, 1.0, %v3114_v15 }
  0xb7   :  { %v577_v12 = vsel %vm3230_vm4, %v2140_v49, -inf  ;;  %v576_v34 = vmax.f32 %v568_v62, %v575_v5  ;;  %v579_v38 = vmax.f32 %v572_v37, %v574_v60  ;;  %vm3233_vm10 = vmmov %vm3202_vm0  ;;  %v3242_v60 = vld [vmem:[#allocation15_spill] sm:$0xff]  ;;  %v469_v11 = vsel %vm3202_vm0, %v409_v53, 0.0 }
  0xb8   :  { %v578_v23 = vmax.f32 %v570_v45, %v577_v12  ;;  %v455_v42 = vsel %vm3233_vm10, %v402_v20, 0.0  ;;  %v454_v30 = vadd.f32 %v453_v6, %v452_v33  ;;  %vm3235_vm5 = vmmov %vm3202_vm0  ;;  %vm3243_vm1 = vcmp.eq.f32.partialorder %v3242_v60, %v1755_v39  ;;  %v3249_v33 = vld [vmem:[#allocation18_spill] sm:$0xff]  ;;  %v3259_v60 = vld [vmem:[#allocation11_spill] sm:$0xff] }
  0xb9   :  { %v457_v9 = vsel %vm3235_vm5, %v403_v19, 0.0  ;;  %vm3237_vm12 = vmmov %vm3202_vm0  ;;  %v408_v54 = vsel %vm3243_vm1, 1.0, %v3114_v15  ;;  %v242_v5 = vrot.slane %v241_v61, 1  ;;  %vm3250_vm7 = vcmp.eq.f32.partialorder %v3249_v33, %v1755_v39 }
  0xba   :  { %v580_v56 = vmax.f32 %v576_v34, %v578_v23  ;;  %v456_v3 = vadd.f32 %v455_v42, %v454_v30  ;;  %v459_v43 = vsel %vm3237_vm12, %v404_v25, 0.0  ;;  %vm3239_vm15 = vmmov %vm3202_vm0 }
  0xbb   :  { %v461_v10 = vsel %vm3239_vm15, %v405_v36, 0.0  ;;  %vm3241_vm11 = vmmov %vm3202_vm0  ;;  %v243_v19 = vadd.f32 %v242_v5, %v241_v61  ;;  %v3255_v61 = vld [vmem:[#allocation6_spill] sm:$0xff] }
  0xbc   :  { %v581_v44 = vmax.f32 %v579_v38, %v580_v56  ;;  %v458_v62 = vadd.f32 %v457_v9, %v456_v3  ;;  %v463_v45 = vsel %vm3241_vm11, %v406_v41, 0.0  ;;  %vm3244_vm2 = vmmov %vm3202_vm0  ;;  %v3247_v38 = vld [vmem:[#allocation17_spill] sm:$0xff]  ;;  %v411_v56 = vsel %vm3250_vm7, 1.0, %v3114_v15 }
  0xbd   :  { %v465_v17 = vsel %vm3244_vm2, %v407_v52, 0.0  ;;  %vm3246_vm9 = vmmov %vm3202_vm0  ;;  %vm3248_vm4 = vcmp.eq.f32.partialorder %v3247_v38, %v1755_v39  ;;  %v244_v27 = vmin.f32 %v243_v19, 4.0  ;;  %v3256_v52 = vld [vmem:[#allocation8_spill] sm:$0xff] }
  0xbe   :  { %v582_v32 = vrot.slane %v581_v44, 4  ;;  %v460_v57 = vadd.f32 %v459_v43, %v458_v62  ;;  %v467_v34 = vsel %vm3246_vm9, %v408_v54, 0.0  ;;  %v410_v6 = vsel %vm3248_vm4, 1.0, %v3114_v15  ;;  %vm3251_vm13 = vmmov %vm3202_vm0  ;;  %v3253_v43 = vld [vmem:[#allocation7_spill] sm:$0xff] }
  0xbf   :  { %v471_v25 = vsel %vm3251_vm13, %v410_v6, 0.0  ;;  %vm3252_vm10 = vmmov %vm3202_vm0  ;;  %v2273_v41 = vmul.f32 %v244_v27, %v3253_v43  ;;  %v246_v62 = vsub.f32 4.0, %v244_v27 }
  0xc0   :  { %v583_v63 = vmax.f32 %v581_v44, %v582_v32  ;;  %v462_v20 = vadd.f32 %v461_v10, %v460_v57  ;;  %v473_v9 = vsel %vm3252_vm10, %v411_v56, 0.0  ;;  %v3254_v10 = vld [vmem:[#allocation5_spill] sm:$0xff] }
  0xc1   :  { %v3257_v57 = vld [vmem:[#allocation9_spill] sm:$0xff] }
  0xc2   :  { %v584_v37 = vrot.slane %v583_v63, 2  ;;  %v464_v55 = vadd.f32 %v463_v45, %v462_v20 }
  0xc4   :  { %v585_v23 = vmax.f32 %v583_v63, %v584_v37  ;;  %v466_v35 = vadd.f32 %v465_v17, %v464_v55  ;;  %v3258_v37 = vld [vmem:[#allocation10_spill] sm:$0xff] }
  0xc6   :  { %v468_v42 = vadd.f32 %v467_v34, %v466_v35  ;;  %v586_v30 = vrot.slane %v585_v23, 1 }
  0xc8   :  { %v470_v44 = vadd.f32 %v469_v11, %v468_v42  ;;  %v2270_v3 = vmax.f32 %v585_v23, %v586_v30 }
  0xca   :  { %v472_v36 = vadd.f32 %v471_v25, %v470_v44  ;;  %vm588_vm3 = vcmp.eq.f32.partialorder %v3254_v10, %v2270_v3  ;;  %vm589_vm5 = vcmp.eq.f32.partialorder %v3255_v61, %v2270_v3  ;;  %vm590_vm6 = vcmp.eq.f32.partialorder %v3256_v52, %v2270_v3 }
  0xcb   :  { %vm3006_vm12 = vcmp.eq.f32.partialorder %v3257_v57, %v2270_v3  ;;  %vm3003_vm14 = vcmp.eq.f32.partialorder %v3258_v37, %v2270_v3  ;;  %vm3005_vm15 = vcmp.eq.f32.partialorder %v3259_v60, %v2270_v3  ;;  %vm3004_vm8 = vcmp.eq.f32.partialorder %v1990_v47, %v2270_v3 }
  0xcc   :  { %v474_v32 = vadd.f32 %v473_v9, %v472_v36  ;;  %vm3007_vm11 = vcmp.eq.f32.partialorder %v1996_v18, %v2270_v3  ;;  %vm3008_vm1 = vcmp.eq.f32.partialorder %v2002_v26, %v2270_v3  ;;  %vm604_vm2 = vcmp.eq.f32.partialorder %v2050_v13, %v2270_v3 }
  0xcd   :  { %vm605_vm9 = vcmp.eq.f32.partialorder %v2056_v14, %v2270_v3  ;;  %vm606_vm4 = vcmp.eq.f32.partialorder %v2062_v50, %v2270_v3  ;;  %vm607_vm0 = vcmp.eq.f32.partialorder %v2068_v48, %v2270_v3  ;;  %vm3011_vm7 = vcmp.eq.f32.partialorder %v2074_v21, %v2270_v3 }
  0xce   :  { %v475_v63 = vrot.slane %v474_v32, 4  ;;  %vm3010_vm13 = vcmp.eq.f32.partialorder %v2080_v22, %v2270_v3  ;;  %vm3009_vm10 = vcmp.eq.f32.partialorder %v2086_v46, %v2270_v3  ;;  %v620_v17 = vsel %vm588_vm3, 1.0, %v3114_v15 }
  0xcf   :  { %v621_v5 = vsel %vm589_vm5, 1.0, %v3114_v15  ;;  %v622_v12 = vsel %vm590_vm6, 1.0, %v3114_v15  ;;  %v623_v55 = vsel %vm3006_vm12, 1.0, %v3114_v15  ;;  %v624_v34 = vsel %vm3003_vm14, 1.0, %v3114_v15 }
  0xd0   :  { %v476_v45 = vadd.f32 %v475_v63, %v474_v32  ;;  %v625_v23 = vsel %vm3005_vm15, 1.0, %v3114_v15  ;;  %v626_v38 = vsel %vm3004_vm8, 1.0, %v3114_v15  ;;  %v627_v6 = vsel %vm3007_vm11, 1.0, %v3114_v15 }
  0xd1   :  { %v628_v35 = vsel %vm3008_vm1, 1.0, %v3114_v15  ;;  %vm3260_vm14 = vcmp.eq.f32.partialorder %v2008_v1, %v2270_v3  ;;  %vm3261_vm8 = vcmp.eq.f32.partialorder %v2014_v2, %v2270_v3  ;;  %vm3262_vm15 = vcmask 64512  }
  0xd2   :  { %v477_v54 = vrot.slane %v476_v45, 2  ;;  %v629_v11 = vsel %vm3260_vm14, 1.0, %v3114_v15  ;;  %v630_v33 = vsel %vm3261_vm8, 1.0, %v3114_v15  ;;  %v652_v56 = vsel %vm3262_vm15, %v620_v17, 0.0  ;;  %vm3263_vm12 = vmmov %vm3262_vm15 }
  0xd3   :  { %v653_v42 = vsel %vm3263_vm12, %v621_v5, 0.0  ;;  %vm3264_vm11 = vcmp.eq.f32.partialorder %v2020_v31, %v2270_v3  ;;  %vm3265_vm1 = vcmp.eq.f32.partialorder %v2026_v4, %v2270_v3  ;;  %vm3266_vm14 = vmmov %vm3263_vm12  ;;  %vm3267_vm15 = vcmp.eq.f32.partialorder %v2032_v7, %v2270_v3 }
  0xd4   :  { %v478_v20 = vadd.f32 %v477_v54, %v476_v45  ;;  %v631_v25 = vsel %vm3264_vm11, 1.0, %v3114_v15  ;;  %v632_v30 = vsel %vm3265_vm1, 1.0, %v3114_v15  ;;  %v654_v44 = vadd.f32 %v653_v42, %v652_v56  ;;  %vm3269_vm8 = vmmov %vm3266_vm14 }
  0xd5   :  { %v655_v9 = vsel %vm3266_vm14, %v622_v12, 0.0  ;;  %v633_v36 = vsel %vm3267_vm15, 1.0, %v3114_v15  ;;  %vm3268_vm12 = vcmp.eq.f32.partialorder %v2038_v8, %v2270_v3  ;;  %v657_v43 = vsel %vm3269_vm8, %v623_v55, 0.0  ;;  %vm3272_vm14 = vmmov %vm3269_vm8 }
  0xd6   :  { %v479_v53 = vrot.slane %v478_v20, 1  ;;  %v634_v32 = vsel %vm3268_vm12, 1.0, %v3114_v15  ;;  %vm3270_vm11 = vcmp.eq.f32.partialorder %v2044_v40, %v2270_v3  ;;  %v636_v45 = vsel %vm604_vm2, 1.0, %v3114_v15  ;;  %vm3273_vm15 = vmmov %vm3269_vm8 }
  0xd7   :  { %v635_v63 = vsel %vm3270_vm11, 1.0, %v3114_v15  ;;  %v637_v54 = vsel %vm605_vm9, 1.0, %v3114_v15  ;;  %v659_v12 = vsel %vm3272_vm14, %v624_v34, 0.0  ;;  %v639_v55 = vsel %vm607_vm0, 1.0, %v3114_v15  ;;  %vm3275_vm14 = vmmov %vm3269_vm8 }
  0xd8   :  { %v480_v19 = vadd.f32 %v479_v53, %v478_v20  ;;  %v656_v20 = vadd.f32 %v655_v9, %v654_v44  ;;  %v638_v53 = vsel %vm606_vm4, 1.0, %v3114_v15  ;;  %v2419_v34 = vsel %vm3010_vm13, 1.0, %v3114_v15  ;;  %vm3277_vm13 = vmmov %vm3269_vm8 }
  0xd9   :  { %v2425_v56 = vsel %vm3009_vm10, 1.0, %v3114_v15  ;;  %v661_v42 = vsel %vm3273_vm15, %v625_v23, 0.0  ;;  %vm3276_vm10 = vmmov %vm3269_vm8 }
  0xda   :  { %v481_v27 = vmin.f32 %v480_v19, %v246_v62  ;;  %v2413_v19 = vsel %vm3011_vm7, 1.0, %v3114_v15  ;;  %v665_v23 = vsel %vm3276_vm10, %v627_v6, 0.0  ;;  %vm3278_vm11 = vmmov %vm3269_vm8  ;;  %vm618_vm10 = vcmp.eq.f32.partialorder %v2134_v16, %v2270_v3 }
  0xdb   :  { %vm3279_vm7 = vmmov %vm3269_vm8 }
  0xdc   :  { %vm482_vm1 = vcmp.gt.f32.partialorder %v481_v27, 0.0  ;;  %v483_v17 = vmul.f32 %v481_v27, %v1755_v39  ;;  %v2398_v5 = vsub.f32 %v246_v62, %v481_v27  ;;  %v658_v39 = vadd.f32 %v657_v43, %v656_v20 }
  0xdd   :  { %v663_v27 = vsel %vm3275_vm14, %v626_v38, 0.0  ;;  %v669_v43 = vsel %vm3278_vm11, %v629_v11, 0.0  ;;  %v671_v20 = vsel %vm3279_vm7, %v630_v33, 0.0 }
  0xde   :  { %3271 = vst [vmem:[#allocation14_spill] sm:$0xff] %v2398_v5  ;;  %v484_v62 = vsel %vm482_vm1, %v483_v17, 0.0  ;;  %v660_v9 = vadd.f32 %v659_v12, %v658_v39  ;;  %vm3280_vm1 = vmmov %vm3279_vm7 }
  0xdf   :  { %v2429_v44 = vadd.f32 %v484_v62, %v2273_v41  ;;  %v667_v41 = vsel %vm3277_vm13, %v628_v35, 0.0  ;;  %v673_v17 = vsel %vm3280_vm1, %v631_v25, 0.0  ;;  %vm3281_vm15 = vmmov %vm3280_vm1  ;;  %v2470_v25 = vsel %vm3280_vm1, %v638_v53, 0.0 }
  0xe0   :  { %v662_v38 = vadd.f32 %v661_v42, %v660_v9  ;;  %v675_v6 = vsel %vm3281_vm15, %v632_v30, 0.0  ;;  %vm3282_vm12 = vmmov %vm3280_vm1  ;;  %vm3301_vm15 = vcmp.eq.f32.partialorder %v2002_v26, %v2270_v3 }
  0xe1   :  { %3274 = vst [vmem:[#allocation15_spill] sm:$0xff] %v2429_v44  ;;  %v677_v12 = vsel %vm3282_vm12, %v633_v36, 0.0  ;;  %vm3283_vm8 = vmmov %vm3280_vm1  ;;  %v2479_v36 = vsel %vm588_vm3, -inf, %v3254_v10  ;;  %vm3291_vm12 = vcmp.eq.f32.partialorder %v3257_v57, %v2270_v3  ;;  %vm3293_vm3 = vcmp.eq.f32.partialorder %v3258_v37, %v2270_v3 }
  0xe2   :  { %v2458_v39 = vsel %vm3283_vm8, %v634_v32, 0.0  ;;  %vm3284_vm13 = vmmov %vm3280_vm1  ;;  %v664_v62 = vadd.f32 %v663_v27, %v662_v38  ;;  %3288 = vst [vmem:[#allocation16_spill] sm:$0xff] %v2479_v36  ;;  %v2485_v32 = vsel %vm589_vm5, -inf, %v3255_v61  ;;  %v2503_v10 = vsel %vm3293_vm3, -inf, %v3258_v37 }
  0xe3   :  { %v2461_v35 = vsel %vm3284_vm13, %v635_v63, 0.0  ;;  %vm3285_vm7 = vmmov %vm3280_vm1  ;;  %3289 = vst [vmem:[#allocation17_spill] sm:$0xff] %v2485_v32  ;;  %v2491_v63 = vsel %vm590_vm6, -inf, %v3256_v52  ;;  %vm3295_vm5 = vcmp.eq.f32.partialorder %v3259_v60, %v2270_v3  ;;  %vm3297_vm6 = vcmp.eq.f32.partialorder %v1990_v47, %v2270_v3 }
  0xe4   :  { %v2464_v11 = vsel %vm3285_vm7, %v636_v45, 0.0  ;;  %vm3286_vm11 = vmmov %vm3280_vm1  ;;  %3290 = vst [vmem:[#allocation18_spill] sm:$0xff] %v2491_v63  ;;  %v2497_v45 = vsel %vm3291_vm12, -inf, %v3257_v57  ;;  %v2509_v61 = vsel %vm3295_vm5, -inf, %v3259_v60  ;;  %v666_v52 = vadd.f32 %v665_v23, %v664_v62 }
  0xe5   :  { %v2467_v33 = vsel %vm3286_vm11, %v637_v54, 0.0  ;;  %vm3287_vm14 = vmmov %vm3280_vm1  ;;  %3292 = vst [vmem:[#allocation7_spill] sm:$0xff] %v2497_v45  ;;  %v2515_v54 = vsel %vm3297_vm6, -inf, %v1990_v47  ;;  %vm3299_vm8 = vcmp.eq.f32.partialorder %v1996_v18, %v2270_v3  ;;  %v2527_v37 = vsel %vm3301_vm15, -inf, %v2002_v26 }
  0xe6   :  { %v2473_v30 = vsel %vm3287_vm14, %v639_v55, 0.0  ;;  %3294 = vst [vmem:[#allocation5_spill] sm:$0xff] %v2503_v10  ;;  %3296 = vst [vmem:[#allocation6_spill] sm:$0xff] %v2509_v61  ;;  %v2521_v57 = vsel %vm3299_vm8, -inf, %v1996_v18  ;;  %vm3302_vm14 = vcmp.eq.f32.partialorder %v2008_v1, %v2270_v3  ;;  %vm3303_vm13 = vcmp.eq.f32.partialorder %v2014_v2, %v2270_v3 }
  0xe7   :  { %3298 = vst [vmem:[#allocation8_spill] sm:$0xff] %v2515_v54  ;;  %3300 = vst [vmem:[#allocation9_spill] sm:$0xff] %v2521_v57  ;;  %v2533_v60 = vsel %vm3302_vm14, -inf, %v2008_v1  ;;  %v2539_v47 = vsel %vm3303_vm13, -inf, %v2014_v2  ;;  %vm3304_vm7 = vcmp.eq.f32.partialorder %v2020_v31, %v2270_v3  ;;  %vm3305_vm11 = vcmp.eq.f32.partialorder %v2026_v4, %v2270_v3 }
  0xe8   :  { %v2545_v18 = vsel %vm3304_vm7, -inf, %v2020_v31  ;;  %v2551_v26 = vsel %vm3305_vm11, -inf, %v2026_v4  ;;  %v668_v1 = vadd.f32 %v667_v41, %v666_v52  ;;  %vm3306_vm1 = vcmp.eq.f32.partialorder %v2032_v7, %v2270_v3 }
  0xe9   :  { %v2557_v53 = vsel %vm3306_vm1, -inf, %v2032_v7  ;;  %vm3307_vm12 = vcmp.eq.f32.partialorder %v2038_v8, %v2270_v3  ;;  %vm3308_vm3 = vcmp.eq.f32.partialorder %v2044_v40, %v2270_v3  ;;  %v2575_v4 = vsel %vm604_vm2, -inf, %v2050_v13 }
  0xea   :  { %v2563_v2 = vsel %vm3307_vm12, -inf, %v2038_v8  ;;  %v2569_v31 = vsel %vm3308_vm3, -inf, %v2044_v40  ;;  %v2581_v7 = vsel %vm605_vm9, -inf, %v2056_v14  ;;  %v2587_v8 = vsel %vm606_vm4, -inf, %v2062_v50 }
  0xeb   :  { %v2593_v40 = vsel %vm607_vm0, -inf, %v2068_v48  ;;  %v670_v13 = vadd.f32 %v669_v43, %v668_v1  ;;  %vm3309_vm2 = vcmp.eq.f32.partialorder %v2074_v21, %v2270_v3  ;;  %vm3310_vm9 = vcmp.eq.f32.partialorder %v2080_v22, %v2270_v3 }
  0xec   :  { %v2599_v55 = vsel %vm3309_vm2, -inf, %v2074_v21  ;;  %v2605_v14 = vsel %vm3310_vm9, -inf, %v2080_v22  ;;  %vm3311_vm4 = vcmp.eq.f32.partialorder %v2086_v46, %v2270_v3  ;;  %vm3312_vm0 = vcmp.eq.f32.partialorder %v2092_v28, %v2270_v3 }
  0xed   :  { %v2611_v50 = vsel %vm3311_vm4, -inf, %v2086_v46  ;;  %v2617_v48 = vsel %vm3312_vm0, -inf, %v2092_v28  ;;  %vm3313_vm5 = vcmp.eq.f32.partialorder %v2098_v29, %v2270_v3  ;;  %vm3314_vm6 = vcmp.eq.f32.partialorder %v2104_v51, %v2270_v3 }
  0xee   :  { %v2623_v21 = vsel %vm3313_vm5, -inf, %v2098_v29  ;;  %v2629_v22 = vsel %vm3314_vm6, -inf, %v2104_v51  ;;  %vm3315_vm8 = vcmp.eq.f32.partialorder %v2110_v0, %v2270_v3  ;;  %v672_v42 = vadd.f32 %v671_v20, %v670_v13 }
  0xef   :  { %v2635_v46 = vsel %vm3315_vm8, -inf, %v2110_v0  ;;  %vm3316_vm15 = vcmp.eq.f32.partialorder %v2116_v24, %v2270_v3  ;;  %vm3317_vm14 = vcmp.eq.f32.partialorder %v2122_v58, %v2270_v3  ;;  %vm3318_vm13 = vcmp.eq.f32.partialorder %v2128_v59, %v2270_v3 }
  0xf0   :  { %v2641_v9 = vsel %vm3316_vm15, -inf, %v2116_v24  ;;  %v2647_v27 = vsel %vm3317_vm14, -inf, %v2122_v58  ;;  %v2653_v23 = vsel %vm3318_vm13, -inf, %v2128_v59  ;;  %v2659_v41 = vsel %vm618_vm10, -inf, %v2134_v16 }
  0xf1   :  { %vm3319_vm7 = vcmp.eq.f32.partialorder %v2140_v49, %v2270_v3  ;;  %vm3320_vm11 = vcmask 64512   ;;  %v674_v62 = vadd.f32 %v673_v17, %v672_v42 }
  0xf2   :  { %v2665_v43 = vsel %vm3319_vm7, -inf, %v2140_v49  ;;  %v759_v20 = vsel %vm3320_vm11, %v2479_v36, -inf  ;;  %vm3321_vm1 = vmmov %vm3320_vm11 }
  0xf3   :  { %v760_v38 = vsel %vm3321_vm1, %v2485_v32, -inf  ;;  %vm3322_vm12 = vmmov %vm3321_vm1  ;;  %v676_v17 = vadd.f32 %v675_v6, %v674_v62 }
  0xf4   :  { %v761_v52 = vsel %vm3322_vm12, %v2491_v63, -inf  ;;  %vm3323_vm3 = vmmov %vm3321_vm1 }
  0xf5   :  { %v762_v1 = vsel %vm3323_vm3, %v2497_v45, -inf  ;;  %vm3324_vm2 = vmmov %vm3321_vm1 }
  0xf6   :  { %v763_v13 = vsel %vm3324_vm2, %v2503_v10, -inf  ;;  %vm3325_vm9 = vmmov %vm3321_vm1 }
  0xf7   :  { %v764_v44 = vmax.f32 %v759_v20, %v763_v13  ;;  %v765_v5 = vsel %vm3325_vm9, %v2509_v61, -inf  ;;  %vm3326_vm4 = vmmov %vm3321_vm1 }
  0xf8   :  { %v767_v36 = vsel %vm3326_vm4, %v2515_v54, -inf  ;;  %vm3327_vm0 = vmmov %vm3321_vm1  ;;  %v766_v42 = vmax.f32 %v760_v38, %v765_v5  ;;  %v678_v54 = vadd.f32 %v677_v12, %v676_v17 }
  0xf9   :  { %v769_v32 = vsel %vm3327_vm0, %v2521_v57, -inf  ;;  %v768_v49 = vmax.f32 %v761_v52, %v767_v36  ;;  %vm3328_vm5 = vmmov %vm3327_vm0 }
  0xfa   :  { %v770_v63 = vmax.f32 %v762_v1, %v769_v32  ;;  %v771_v45 = vsel %vm3328_vm5, %v2527_v37, -inf  ;;  %vm3329_vm6 = vmmov %vm3327_vm0  ;;  %v680_v38 = vadd.f32 %v2458_v39, %v678_v54 }
  0xfb   :  { %v773_v10 = vsel %vm3329_vm6, %v2533_v60, -inf  ;;  %vm3330_vm8 = vmmov %vm3327_vm0  ;;  %v772_v61 = vmax.f32 %v764_v44, %v771_v45 }
  0xfc   :  { %v775_v20 = vsel %vm3330_vm8, %v2539_v47, -inf  ;;  %vm3331_vm15 = vmmov %vm3327_vm0  ;;  %v774_v16 = vmax.f32 %v766_v42, %v773_v10  ;;  %v682_v45 = vadd.f32 %v2461_v35, %v680_v38  ;;  %v799_v35 = vsel %vm3327_vm0, %v2611_v50, -inf }
  0xfd   :  { %v777_v13 = vsel %vm3331_vm15, %v2545_v18, -inf  ;;  %v776_v57 = vmax.f32 %v768_v49, %v775_v20  ;;  %vm3332_vm14 = vmmov %vm3327_vm0 }
  0xfe   :  { %v778_v6 = vmax.f32 %v770_v63, %v777_v13  ;;  %v779_v5 = vsel %vm3332_vm14, %v2551_v26, -inf  ;;  %vm3333_vm13 = vmmov %vm3327_vm0  ;;  %v684_v42 = vadd.f32 %v2464_v11, %v682_v45 }
  0xff   :  { %v781_v36 = vsel %vm3333_vm13, %v2557_v53, -inf  ;;  %vm3334_vm7 = vmmov %vm3327_vm0  ;;  %v780_v62 = vmax.f32 %v772_v61, %v779_v5 }
 0x100   :  { %v783_v32 = vsel %vm3334_vm7, %v2563_v2, -inf  ;;  %v782_v52 = vmax.f32 %v774_v16, %v781_v36  ;;  %vm3335_vm11 = vmmov %vm3327_vm0  ;;  %v686_v38 = vadd.f32 %v2467_v33, %v684_v42 }
 0x101   :  { %v784_v1 = vmax.f32 %v776_v57, %v783_v32  ;;  %v785_v44 = vsel %vm3335_vm11, %v2569_v31, -inf  ;;  %vm3336_vm1 = vmmov %vm3327_vm0 }
 0x102   :  { %v787_v49 = vsel %vm3336_vm1, %v2575_v4, -inf  ;;  %vm3337_vm12 = vmmov %vm3327_vm0  ;;  %v786_v10 = vmax.f32 %v778_v6, %v785_v44 }
 0x103   :  { %v789_v12 = vsel %vm3337_vm12, %v2581_v7, -inf  ;;  %vm3338_vm3 = vmmov %vm3327_vm0  ;;  %v788_v17 = vmax.f32 %v780_v62, %v787_v49 }
 0x104   :  { %v791_v63 = vsel %vm3338_vm3, %v2587_v8, -inf  ;;  %v790_v39 = vmax.f32 %v782_v52, %v789_v12  ;;  %vm3339_vm2 = vmmov %vm3327_vm0 }
 0x105   :  { %v792_v61 = vmax.f32 %v784_v1, %v791_v63  ;;  %v793_v16 = vsel %vm3339_vm2, %v2593_v40, -inf  ;;  %vm3340_vm9 = vmmov %vm3327_vm0  ;;  %v688_v63 = vadd.f32 %v2470_v25, %v686_v38  ;;  %vm3353_vm2 = vcmp.eq.f32.partialorder %v2092_v28, %v2270_v3 }
 0x106   :  { %v795_v54 = vsel %vm3340_vm9, %v2599_v55, -inf  ;;  %vm3341_vm4 = vmmov %vm3327_vm0  ;;  %v794_v20 = vmax.f32 %v786_v10, %v793_v16 }
 0x107   :  { %v797_v57 = vsel %vm3341_vm4, %v2605_v14, -inf  ;;  %v796_v13 = vmax.f32 %v788_v17, %v795_v54  ;;  %vm3342_vm5 = vmmov %vm3327_vm0  ;;  %v800_v62 = vmax.f32 %v792_v61, %v799_v35  ;;  %v690_v54 = vadd.f32 %v2473_v30, %v688_v63 }
 0x108   :  { %v798_v5 = vmax.f32 %v790_v39, %v797_v57  ;;  %v801_v6 = vsel %vm3342_vm5, %v2617_v48, -inf  ;;  %vm3343_vm6 = vmmov %vm3327_vm0  ;;  %vm3355_vm4 = vcmp.eq.f32.partialorder %v2098_v29, %v2270_v3  ;;  %vm3356_vm5 = vcmp.eq.f32.partialorder %v2104_v51, %v2270_v3 }
 0x109   :  { %v803_v36 = vsel %vm3343_vm6, %v2623_v21, -inf  ;;  %vm3344_vm8 = vmmov %vm3327_vm0  ;;  %v802_v52 = vmax.f32 %v794_v20, %v801_v6  ;;  %v644_v30 = vsel %vm3355_vm4, 1.0, %v3114_v15  ;;  %v645_v28 = vsel %vm3356_vm5, 1.0, %v3114_v15 }
 0x10a   :  { %v805_v32 = vsel %vm3344_vm8, %v2629_v22, -inf  ;;  %v804_v11 = vmax.f32 %v796_v13, %v803_v36  ;;  %vm3345_vm15 = vmmov %vm3327_vm0  ;;  %vm3358_vm8 = vcmp.eq.f32.partialorder %v2110_v0, %v2270_v3 }
 0x10b   :  { %v806_v1 = vmax.f32 %v798_v5, %v805_v32  ;;  %v807_v44 = vsel %vm3345_vm15, %v2635_v46, -inf  ;;  %vm3346_vm14 = vmmov %vm3327_vm0 }
 0x10c   :  { %v809_v49 = vsel %vm3346_vm14, %v2641_v9, -inf  ;;  %vm3347_vm13 = vmmov %vm3327_vm0  ;;  %v808_v45 = vmax.f32 %v800_v62, %v807_v44  ;;  %vm3360_vm14 = vcmp.eq.f32.partialorder %v2116_v24, %v2270_v3 }
 0x10d   :  { %v811_v12 = vsel %vm3347_vm13, %v2647_v27, -inf  ;;  %v810_v10 = vmax.f32 %v802_v52, %v809_v49  ;;  %vm3348_vm7 = vmmov %vm3327_vm0 }
 0x10e   :  { %v812_v17 = vmax.f32 %v804_v11, %v811_v12  ;;  %v691_v33 = vsel %vm3348_vm7, %v2413_v19, 0.0  ;;  %vm3349_vm11 = vmmov %vm3327_vm0  ;;  %v643_v19 = vsel %vm3353_vm2, 1.0, %v3114_v15  ;;  %vm3362_vm7 = vcmp.eq.f32.partialorder %v2122_v58, %v2270_v3 }
 0x10f   :  { %v813_v39 = vsel %vm3349_vm11, %v2653_v23, -inf  ;;  %vm3350_vm1 = vmmov %vm3327_vm0  ;;  %v692_v13 = vadd.f32 %v691_v33, %v690_v54  ;;  %v648_v12 = vsel %vm3362_vm7, 1.0, %v3114_v15  ;;  %v3382_v33 = vld [vmem:[#allocation8_spill] sm:$0xff] }
 0x110   :  { %v815_v61 = vsel %vm3350_vm1, %v2659_v41, -inf  ;;  %vm3351_vm12 = vmmov %vm3327_vm0  ;;  %v814_v57 = vmax.f32 %v806_v1, %v813_v39  ;;  %v647_v1 = vsel %vm3360_vm14, 1.0, %v3114_v15  ;;  %vm3364_vm1 = vcmp.eq.f32.partialorder %v2128_v59, %v2270_v3 }
 0x111   :  { %v817_v16 = vsel %vm3351_vm12, %v2665_v43, -inf  ;;  %v816_v42 = vmax.f32 %v808_v45, %v815_v61  ;;  %vm3352_vm3 = vmmov %vm3327_vm0  ;;  %v649_v45 = vsel %vm3364_vm1, 1.0, %v3114_v15  ;;  %v650_v39 = vsel %vm618_vm10, 1.0, %v3114_v15 }
 0x112   :  { %v818_v25 = vmax.f32 %v810_v10, %v817_v16  ;;  %v693_v20 = vsel %vm3352_vm3, %v2419_v34, 0.0  ;;  %v819_v5 = vmax.f32 %v812_v17, %v814_v57  ;;  %vm3354_vm9 = vmmov %vm3327_vm0  ;;  %v697_v34 = vsel %vm3327_vm0, %v643_v19, 0.0  ;;  %v3368_v16 = vld [vmem:[#allocation13_spill] sm:$0xff] }
 0x113   :  { %v695_v6 = vsel %vm3354_vm9, %v2425_v56, 0.0  ;;  %v694_v36 = vadd.f32 %v693_v20, %v692_v13  ;;  %vm3357_vm6 = vmmov %vm3327_vm0  ;;  %v646_v56 = vsel %vm3358_vm8, 1.0, %v3114_v15  ;;  %vm3369_vm2 = vcmp.eq.f32.partialorder %v3368_v16, %v2270_v3 }
 0x114   :  { %v820_v35 = vmax.f32 %v816_v42, %v818_v25  ;;  %v699_v52 = vsel %vm3357_vm6, %v644_v30, 0.0  ;;  %vm3359_vm15 = vmmov %vm3327_vm0  ;;  %v651_v54 = vsel %vm3369_vm2, 1.0, %v3114_v15 }
 0x115   :  { %v696_v38 = vadd.f32 %v695_v6, %v694_v36  ;;  %v701_v11 = vsel %vm3359_vm15, %v645_v28, 0.0  ;;  %vm3361_vm13 = vmmov %vm3327_vm0  ;;  %v3374_v28 = vld [vmem:[#allocation18_spill] sm:$0xff] }
 0x116   :  { %v821_v32 = vmax.f32 %v819_v5, %v820_v35  ;;  %v703_v49 = vsel %vm3361_vm13, %v646_v56, 0.0  ;;  %vm3363_vm11 = vmmov %vm3327_vm0 }
 0x117   :  { %v698_v29 = vadd.f32 %v697_v34, %v696_v38  ;;  %v705_v0 = vsel %vm3363_vm11, %v647_v1, 0.0  ;;  %vm3365_vm12 = vmmov %vm3327_vm0  ;;  %v3373_v34 = vld [vmem:[#allocation17_spill] sm:$0xff] }
 0x118   :  { %v822_v62 = vrot.slane %v821_v32, 4  ;;  %v707_v17 = vsel %vm3365_vm12, %v648_v12, 0.0  ;;  %vm3367_vm3 = vmmov %vm3327_vm0 }
 0x119   :  { %v700_v44 = vadd.f32 %v699_v52, %v698_v29  ;;  %v709_v58 = vsel %vm3367_vm3, %v649_v45, 0.0  ;;  %vm3370_vm9 = vmmov %vm3327_vm0 }
 0x11a   :  { %v823_v51 = vmax.f32 %v821_v32, %v822_v62  ;;  %v711_v42 = vsel %vm3370_vm9, %v650_v39, 0.0  ;;  %vm3371_vm4 = vmmov %vm3327_vm0  ;;  %v3372_v32 = vld [vmem:[#allocation16_spill] sm:$0xff]  ;;  %v3375_v62 = vld [vmem:[#allocation7_spill] sm:$0xff] }
 0x11b   :  { %v702_v63 = vadd.f32 %v701_v11, %v700_v44  ;;  %v713_v20 = vsel %vm3371_vm4, %v651_v54, 0.0  ;;  %v3376_v11 = vld [vmem:[#allocation5_spill] sm:$0xff]  ;;  %vm3378_vm14 = vmmov %vm3367_vm3 }
 0x11c   :  { %v824_v24 = vrot.slane %v823_v51, 2  ;;  %vm3379_vm13 = vmmov %vm3367_vm3 }
 0x11d   :  { %v704_v10 = vadd.f32 %v703_v49, %v702_v63  ;;  %v3377_v49 = vld [vmem:[#allocation6_spill] sm:$0xff]  ;;  %vm3380_vm7 = vmmov %vm3367_vm3 }
 0x11e   :  { %v825_v59 = vmax.f32 %v823_v51, %v824_v24  ;;  %v3381_v24 = vld [vmem:[#allocation14_spill] sm:$0xff]  ;;  %vm3383_vm1 = vmmov %vm3367_vm3 }
 0x11f   :  { %v706_v61 = vadd.f32 %v705_v0, %v704_v10  ;;  %vm3385_vm2 = vmmov %vm3383_vm1 }
 0x120   :  { %v826_v13 = vrot.slane %v825_v59, 1  ;;  %vm3386_vm4 = vmmov %vm3383_vm1 }
 0x121   :  { %v708_v57 = vadd.f32 %v707_v17, %v706_v61  ;;  %v3384_v61 = vld [vmem:[#allocation9_spill] sm:$0xff] }
 0x122   :  { %v2788_v6 = vmax.f32 %v825_v59, %v826_v13  ;;  %v3387_v13 = vld [vmem:[#allocation15_spill] sm:$0xff] }
 0x123   :  { %v710_v25 = vadd.f32 %v709_v58, %v708_v57 }
 0x124   :  { %vm828_vm10 = vcmp.eq.f32.partialorder %v3372_v32, %v2788_v6  ;;  %vm829_vm0 = vcmp.eq.f32.partialorder %v3373_v34, %v2788_v6  ;;  %vm830_vm5 = vcmp.eq.f32.partialorder %v3374_v28, %v2788_v6  ;;  %vm831_vm6 = vcmp.eq.f32.partialorder %v3375_v62, %v2788_v6 }
 0x125   :  { %v712_v19 = vadd.f32 %v711_v42, %v710_v25  ;;  %v860_v52 = vsel %vm828_vm10, 1.0, %v3114_v15  ;;  %v861_v56 = vsel %vm829_vm0, 1.0, %v3114_v15  ;;  %vm832_vm8 = vcmp.eq.f32.partialorder %v3376_v11, %v2788_v6  ;;  %vm3388_vm0 = vmmov %vm3383_vm1 }
 0x126   :  { %v862_v1 = vsel %vm830_vm5, 1.0, %v3114_v15  ;;  %v863_v44 = vsel %vm831_vm6, 1.0, %v3114_v15  ;;  %vm833_vm15 = vcmp.eq.f32.partialorder %v3377_v49, %v2788_v6  ;;  %v892_v12 = vsel %vm3378_vm14, %v860_v52, 0.0  ;;  %vm3389_vm6 = vmmov %vm3388_vm0 }
 0x127   :  { %v714_v5 = vadd.f32 %v713_v20, %v712_v19  ;;  %v893_v63 = vsel %vm3379_vm13, %v861_v56, 0.0  ;;  %v864_v0 = vsel %vm832_vm8, 1.0, %v3114_v15  ;;  %v895_v10 = vsel %vm3380_vm7, %v862_v1, 0.0  ;;  %vm3391_vm13 = vmmov %vm3388_vm0 }
 0x128   :  { %v894_v45 = vadd.f32 %v893_v63, %v892_v12  ;;  %vm834_vm11 = vcmp.eq.f32.partialorder %v3382_v33, %v2788_v6  ;;  %v897_v39 = vsel %vm3383_vm1, %v863_v44, 0.0  ;;  %vm835_vm12 = vcmp.eq.f32.partialorder %v3384_v61, %v2788_v6 }
 0x129   :  { %v715_v35 = vrot.slane %v714_v5, 4  ;;  %v865_v58 = vsel %vm833_vm15, 1.0, %v3114_v15  ;;  %v899_v59 = vsel %vm3385_vm2, %v864_v0, 0.0  ;;  %v866_v42 = vsel %vm834_vm11, 1.0, %v3114_v15  ;;  %vm3390_vm15 = vmmov %vm3388_vm0 }
 0x12a   :  { %v896_v16 = vadd.f32 %v895_v10, %v894_v45  ;;  %vm836_vm9 = vcmp.eq.f32.partialorder %v2527_v37, %v2788_v6  ;;  %v901_v19 = vsel %vm3386_vm4, %v865_v58, 0.0  ;;  %vm837_vm10 = vcmp.eq.f32.partialorder %v2533_v60, %v2788_v6  ;;  %vm3392_vm11 = vmmov %vm3388_vm0 }
 0x12b   :  { %v716_v30 = vadd.f32 %v715_v35, %v714_v5  ;;  %v867_v35 = vsel %vm835_vm12, 1.0, %v3114_v15  ;;  %vm838_vm5 = vcmp.eq.f32.partialorder %v2539_v47, %v2788_v6  ;;  %v869_v34 = vsel %vm837_vm10, 1.0, %v3114_v15  ;;  %vm3393_vm12 = vmmov %vm3388_vm0 }
 0x12c   :  { %v898_v25 = vadd.f32 %v897_v39, %v896_v16  ;;  %v905_v37 = vsel %vm3389_vm6, %v867_v35, 0.0  ;;  %vm839_vm8 = vcmp.eq.f32.partialorder %v2545_v18, %v2788_v6  ;;  %v870_v60 = vsel %vm838_vm5, 1.0, %v3114_v15  ;;  %vm3394_vm2 = vmmov %vm3388_vm0 }
 0x12d   :  { %v717_v36 = vrot.slane %v716_v30, 2  ;;  %vm840_vm14 = vcmp.eq.f32.partialorder %v2551_v26, %v2788_v6  ;;  %v909_v52 = vsel %vm3391_vm13, %v869_v34, 0.0  ;;  %v871_v47 = vsel %vm839_vm8, 1.0, %v3114_v15  ;;  %vm3395_vm4 = vmmov %vm3388_vm0 }
 0x12e   :  { %vm841_vm7 = vcmp.eq.f32.partialorder %v2557_v53, %v2788_v6  ;;  %v872_v18 = vsel %vm840_vm14, 1.0, %v3114_v15  ;;  %vm842_vm1 = vcmp.eq.f32.partialorder %v2563_v2, %v2788_v6  ;;  %v913_v1 = vsel %vm3393_vm12, %v871_v47, 0.0  ;;  %vm3396_vm6 = vmmov %vm3388_vm0 }
 0x12f   :  { %v718_v38 = vadd.f32 %v717_v36, %v716_v30  ;;  %v903_v30 = vsel %vm3388_vm0, %v866_v42, 0.0  ;;  %v868_v36 = vsel %vm836_vm9, 1.0, %v3114_v15  ;;  %v873_v26 = vsel %vm841_vm7, 1.0, %v3114_v15  ;;  %vm3398_vm13 = vmmov %vm3388_vm0 }
 0x130   :  { %v874_v53 = vsel %vm842_vm1, 1.0, %v3114_v15  ;;  %vm844_vm9 = vcmp.eq.f32.partialorder %v2575_v4, %v2788_v6  ;;  %v917_v12 = vsel %vm3395_vm4, %v873_v26, 0.0  ;;  %vm845_vm10 = vcmp.eq.f32.partialorder %v2581_v7, %v2788_v6  ;;  %vm3400_vm12 = vmmov %vm3388_vm0 }
 0x131   :  { %v719_v29 = vrot.slane %v718_v38, 1  ;;  %v919_v0 = vsel %vm3388_vm0, %v874_v53, 0.0  ;;  %vm846_vm5 = vcmp.eq.f32.partialorder %v2587_v8, %v2788_v6  ;;  %v877_v4 = vsel %vm845_vm10, 1.0, %v3114_v15  ;;  %vm3402_vm4 = vmmov %vm3388_vm0 }
 0x132   :  { %vm847_vm8 = vcmp.eq.f32.partialorder %v2593_v40, %v2788_v6  ;;  %v878_v7 = vsel %vm846_vm5, 1.0, %v3114_v15  ;;  %vm848_vm14 = vcmp.eq.f32.partialorder %v2599_v55, %v2788_v6  ;;  %v925_v58 = vsel %vm3398_vm13, %v877_v4, 0.0  ;;  %vm3405_vm13 = vmmov %vm3388_vm0 }
 0x133   :  { %v720_v51 = vadd.f32 %v719_v29, %v718_v38  ;;  %v907_v38 = vsel %vm3390_vm15, %v868_v36, 0.0  ;;  %v911_v29 = vsel %vm3392_vm11, %v870_v60, 0.0  ;;  %vm3397_vm15 = vmmov %vm3388_vm0  ;;  %v879_v8 = vsel %vm847_vm8, 1.0, %v3114_v15 }
 0x134   :  { %vm849_vm7 = vcmp.eq.f32.partialorder %v2605_v14, %v2788_v6  ;;  %vm3399_vm11 = vmmov %vm3388_vm0  ;;  %v880_v40 = vsel %vm848_vm14, 1.0, %v3114_v15  ;;  %vm850_vm1 = vcmp.eq.f32.partialorder %v2611_v50, %v2788_v6  ;;  %v929_v42 = vsel %vm3400_vm12, %v879_v8, 0.0 }
 0x135   :  { %v2811_v17 = vmin.f32 %v720_v51, %v3381_v24  ;;  %v915_v51 = vsel %vm3394_vm2, %v872_v18, 0.0  ;;  %v881_v55 = vsel %vm849_vm7, 1.0, %v3114_v15  ;;  %vm3401_vm2 = vmmov %vm3388_vm0  ;;  %v882_v14 = vsel %vm850_vm1, 1.0, %v3114_v15 }
 0x136   :  { %vm853_vm10 = vcmp.eq.f32.partialorder %v2629_v22, %v2788_v6  ;;  %vm854_vm5 = vcmp.eq.f32.partialorder %v2635_v46, %v2788_v6  ;;  %vm855_vm8 = vcmp.eq.f32.partialorder %v2641_v9, %v2788_v6  ;;  %vm856_vm14 = vcmp.eq.f32.partialorder %v2647_v27, %v2788_v6  ;;  %vm3407_vm12 = vmmov %vm3388_vm0 }
 0x137   :  { %vm722_vm3 = vcmp.gt.f32.partialorder %v2811_v17, 0.0  ;;  %v723_v54 = vmul.f32 %v2811_v17, %v2270_v3  ;;  %v726_v57 = vsub.f32 %v3381_v24, %v2811_v17  ;;  %v900_v3 = vadd.f32 %v899_v59, %v898_v25 }
 0x138   :  { %v886_v22 = vsel %vm854_vm5, 1.0, %v3114_v15  ;;  %v887_v46 = vsel %vm855_vm8, 1.0, %v3114_v15  ;;  %vm857_vm7 = vcmp.eq.f32.partialorder %v2653_v23, %v2788_v6  ;;  %v888_v9 = vsel %vm856_vm14, 1.0, %v3114_v15 }
 0x139   :  { %v724_v20 = vsel %vm722_vm3, %v723_v54, 0.0  ;;  %v902_v32 = vadd.f32 %v901_v19, %v900_v3  ;;  %vm843_vm3 = vcmp.eq.f32.partialorder %v2569_v31, %v2788_v6  ;;  %v876_v31 = vsel %vm844_vm9, 1.0, %v3114_v15 }
 0x13a   :  { %v2830_v5 = vadd.f32 %v724_v20, %v3387_v13  ;;  %v875_v2 = vsel %vm843_vm3, 1.0, %v3114_v15  ;;  %v923_v39 = vsel %vm3397_vm15, %v876_v31, 0.0  ;;  %v927_v54 = vsel %vm3399_vm11, %v878_v7, 0.0  ;;  %vm3404_vm15 = vmmov %vm3388_vm0 }
 0x13b   :  { %v904_v28 = vadd.f32 %v903_v30, %v902_v32  ;;  %v921_v10 = vsel %vm3396_vm6, %v875_v2, 0.0  ;;  %vm851_vm3 = vcmp.eq.f32.partialorder %v2617_v48, %v2788_v6  ;;  %v931_v20 = vsel %vm3401_vm2, %v880_v40, 0.0  ;;  %vm3403_vm6 = vmmov %vm3388_vm0 }
 0x13c   :  { %vm852_vm9 = vcmp.eq.f32.partialorder %v2623_v21, %v2788_v6  ;;  %v933_v13 = vsel %vm3402_vm4, %v881_v55, 0.0  ;;  %v883_v50 = vsel %vm851_vm3, 1.0, %v3114_v15  ;;  %v935_v3 = vsel %vm3388_vm0, %v882_v14, 0.0  ;;  %vm3406_vm11 = vmmov %vm3388_vm0 }
 0x13d   :  { %v906_v62 = vadd.f32 %v905_v37, %v904_v28  ;;  %v884_v48 = vsel %vm852_vm9, 1.0, %v3114_v15  ;;  %v937_v36 = vsel %vm3403_vm6, %v883_v50, 0.0  ;;  %v885_v21 = vsel %vm853_vm10, 1.0, %v3114_v15  ;;  %vm3408_vm2 = vmmov %vm3388_vm0 }
 0x13e   :  { %v939_v37 = vsel %vm3404_vm15, %v884_v48, 0.0  ;;  %v941_v28 = vsel %vm3405_vm13, %v885_v21, 0.0  ;;  %v943_v60 = vsel %vm3406_vm11, %v886_v22, 0.0  ;;  %vm858_vm1 = vcmp.eq.f32.partialorder %v2659_v41, %v2788_v6  ;;  %vm3409_vm9 = vmmov %vm3388_vm0 }
 0x13f   :  { %v908_v56 = vadd.f32 %v907_v38, %v906_v62  ;;  %v889_v27 = vsel %vm857_vm7, 1.0, %v3114_v15  ;;  %vm859_vm3 = vcmp.eq.f32.partialorder %v2665_v43, %v2788_v6  ;;  %v890_v23 = vsel %vm858_vm1, 1.0, %v3114_v15  ;;  %vm3410_vm4 = vmmov %vm3388_vm0 }
 0x140   :  { %v949_v18 = vsel %vm3409_vm9, %v889_v27, 0.0  ;;  %v951_v41 = vsel %vm3410_vm4, %v890_v23, 0.0  ;;  %vm3411_vm10 = vmmov %vm3388_vm0  ;;  %vm968_vm5 = vcmask 57344  }
 0x141   :  { %v910_v11 = vadd.f32 %v909_v52, %v908_v56  ;;  %v945_v52 = vsel %vm3407_vm12, %v887_v46, 0.0  ;;  %v947_v56 = vsel %vm3408_vm2, %v888_v9, 0.0 }
 0x143   :  { %v912_v44 = vadd.f32 %v911_v29, %v910_v11  ;;  %v891_v11 = vsel %vm859_vm3, 1.0, %v3114_v15 }
 0x145   :  { %v914_v49 = vadd.f32 %v913_v1, %v912_v44  ;;  %v953_v44 = vsel %vm3411_vm10, %v891_v11, 0.0 }
 0x147   :  { %v916_v63 = vadd.f32 %v915_v51, %v914_v49 }
 0x149   :  { %v918_v45 = vadd.f32 %v917_v12, %v916_v63 }
 0x14b   :  { %v920_v33 = vadd.f32 %v919_v0, %v918_v45 }
 0x14d   :  { %v922_v61 = vadd.f32 %v921_v10, %v920_v33 }
 0x14f   :  { %v924_v16 = vadd.f32 %v923_v39, %v922_v61 }
 0x151   :  { %v926_v59 = vadd.f32 %v925_v58, %v924_v16 }
 0x153   :  { %v928_v25 = vadd.f32 %v927_v54, %v926_v59 }
 0x155   :  { %v930_v19 = vadd.f32 %v929_v42, %v928_v25 }
 0x157   :  { %v932_v35 = vadd.f32 %v931_v20, %v930_v19 }
 0x159   :  { %v934_v30 = vadd.f32 %v933_v13, %v932_v35 }
 0x15b   :  { %v936_v32 = vadd.f32 %v935_v3, %v934_v30 }
 0x15d   :  { %v938_v34 = vadd.f32 %v937_v36, %v936_v32 }
 0x15f   :  { %v940_v38 = vadd.f32 %v939_v37, %v938_v34 }
 0x161   :  { %v942_v62 = vadd.f32 %v941_v28, %v940_v38 }
 0x163   :  { %v944_v47 = vadd.f32 %v943_v60, %v942_v62 }
 0x165   :  { %v946_v29 = vadd.f32 %v945_v52, %v944_v47 }
 0x167   :  { %v948_v1 = vadd.f32 %v947_v56, %v946_v29 }
 0x169   :  { %v950_v26 = vadd.f32 %v949_v18, %v948_v1 }
 0x16b   :  { %v952_v51 = vadd.f32 %v951_v41, %v950_v26 }
 0x16d   :  { %v954_v53 = vadd.f32 %v953_v44, %v952_v51 }
 0x16f   :  { %v955_v49 = vrot.slane %v954_v53, 4 }
 0x171   :  { %v956_v12 = vadd.f32 %v955_v49, %v954_v53 }
 0x173   :  { %v957_v43 = vrot.slane %v956_v12, 2 }
 0x175   :  { %v958_v2 = vadd.f32 %v957_v43, %v956_v12 }
 0x177   :  { %v959_v63 = vrot.slane %v958_v2, 1 }
 0x179   :  { %v960_v0 = vadd.f32 %v959_v63, %v958_v2 }
 0x17b   :  { %v961_v31 = vmin.f32 %v960_v0, %v726_v57 }
 0x17d   :  { %vm962_vm0 = vcmp.gt.f32.partialorder %v961_v31, 0.0  ;;  %v963_v15 = vmul.f32 %v961_v31, %v2788_v6 }
 0x17f   :  { %v964_v45 = vsel %vm962_vm0, %v963_v15, 0.0 }
 0x180   :  { %v965_v10 = vadd.f32 %v964_v45, %v2830_v5 }
 0x182   :  { %v967_v4 = vmul.f32 0.25, %v965_v10 }
 0x184   :  { %969 = vst.msk [vmem:[#allocation2] sm:$0x1] %vm968_vm5, %v967_v4 }
 0x185   :  { %997 = shalt.err (!%p994_p4)
}
 0x186   :  { %s998_s17 = scalar_lea.hbm %s2947_s1, 16 }
 0x187   :  { %p999_p5 = scmp.ne.s32.totalorder %s2947_s1, %s998_s17  ;;  %p1002_p6 = scmp.lt.u32.totalorder %s998_s17, %s2947_s1 }
 0x189   :  { %p1004_p7 = pnand %p1002_p6, %p999_p5 }
 0x18b   :  { %1007 = shalt.err (!%p1004_p7)
}
 0x18c   :  { %979 = dma.vmem_to_hbm [thread:$0]  %s977_s12, 16, %s2947_s1, [#allocation3]  }
 0x18d   :  { %1008 = dma.done.wait [#allocation3], 16  }
 0x18e   :  { %1009 = vsyncadd [#allocation3], 4294967280 }
 0x18f   :  { %983 = vsyncpa [#allocation3], 1 }

</bundles_post_ra>
